<compile_context>
chip_gen: v5e
topology: v5e:2x2
jax: 0.10.0
libtpu: 0.0.40
codegen_flags: <defaults>
</compile_context>

<pallas_src>
import functools

import jax
import jax.numpy as jnp
from jax import lax
from jax.experimental import pallas as pl
from jax.experimental.pallas import tpu as pltpu

# Per-kernel VMEM use is a few MiB by design; 32 MiB leaves headroom and stays
# well under v7x's 64 MiB physical VMEM.
_VMEM_LIMIT = 32 * 1024 * 1024


def _rup(x, m):
    return ((x + m - 1) // m) * m


def _params(*sem):
    return pltpu.CompilerParams(dimension_semantics=sem,
                                vmem_limit_bytes=_VMEM_LIMIT)


def _pick_tm(M, cap=512):
    """Row tile: <=512 (v7x friendly), divides M when possible, and gives
    >=2 grid steps for mid-sized M so both v7x TensorCores get work."""
    if M > cap:
        t = cap
        while t >= 8:
            if M % t == 0:
                return t
            t -= 8
        return cap                 # caller pads
    if M >= 256 and M % 16 == 0:
        return M // 2
    return M


def _apply_act(x, act):
    if act == "relu":
        return jnp.maximum(x, 0.0)
    if act == "lrelu":
        return jnp.where(x > 0, x, 0.01 * x)
    return x


# --------------------------------------------------------------------------
# Generic matmul (bf16 operands, f32 accumulate, fused bias + activation)
# --------------------------------------------------------------------------
def _mm_kernel(a_ref, w_ref, b_ref, o_ref, *, act):
    acc = jnp.dot(a_ref[...], w_ref[...], preferred_element_type=jnp.float32)
    acc = acc + b_ref[...]
    acc = _apply_act(acc, act)
    o_ref[...] = acc.astype(o_ref.dtype)


def pallas_matmul(a, w, bias=None, act="none", out_dtype=jnp.bfloat16):
    M, K = a.shape
    K2, N = w.shape
    assert K == K2
    if K < 8:                           # keep MXU contractions >= 8 wide
        a = jnp.pad(a, ((0, 0), (0, 8 - K)))
        w = jnp.pad(w, ((0, 8 - K), (0, 0)))
        K = 8
    if bias is None:
        bias = jnp.zeros((1, N), jnp.float32)
    bias = bias.reshape(1, N).astype(jnp.float32)
    tm = _pick_tm(M)
    Mp = _rup(M, tm)
    a_p = jnp.pad(a, ((0, Mp - M), (0, 0))) if Mp != M else a
    out = pl.pallas_call(
        functools.partial(_mm_kernel, act=act),
        out_shape=jax.ShapeDtypeStruct((Mp, N), out_dtype),
        grid=(Mp // tm,),
        in_specs=[pl.BlockSpec((tm, K), lambda i: (i, 0)),
                  pl.BlockSpec((K, N), lambda i: (0, 0)),
                  pl.BlockSpec((1, N), lambda i: (0, 0))],
        out_specs=pl.BlockSpec((tm, N), lambda i: (i, 0)),
        compiler_params=_params("parallel"),
    )(a_p, w, bias)
    return out[:M] if Mp != M else out


# --------------------------------------------------------------------------
# LayerNorm (rows over the channel axis)
# --------------------------------------------------------------------------
def _ln_kernel(x_ref, g_ref, b_ref, o_ref, *, eps):
    x = x_ref[...].astype(jnp.float32)
    mean = jnp.mean(x, axis=-1, keepdims=True)
    xc = x - mean
    var = jnp.mean(xc * xc, axis=-1, keepdims=True)
    y = xc * lax.rsqrt(var + eps) * g_ref[...] + b_ref[...]
    o_ref[...] = y.astype(o_ref.dtype)


def pallas_layernorm(x2d, g, b):
    M, C = x2d.shape
    tm = _pick_tm(M)
    if M % tm:
        tm = M
    return pl.pallas_call(
        functools.partial(_ln_kernel, eps=1e-5),
        out_shape=jax.ShapeDtypeStruct((M, C), x2d.dtype),
        grid=(M // tm,),
        in_specs=[pl.BlockSpec((tm, C), lambda i: (i, 0)),
                  pl.BlockSpec((1, C), lambda i: (0, 0)),
                  pl.BlockSpec((1, C), lambda i: (0, 0))],
        out_specs=pl.BlockSpec((tm, C), lambda i: (i, 0)),
        compiler_params=_params("parallel"),
    )(x2d, g, b)


# --------------------------------------------------------------------------
# Channels-last InstanceNorm3d (affine=False) with fused act / residual / act
# --------------------------------------------------------------------------
def _inorm_kernel(*refs, eps, act, post_act, has_res):
    if has_res:
        x_ref, r_ref, o_ref = refs
    else:
        x_ref, o_ref = refs
        r_ref = None
    x = x_ref[...].astype(jnp.float32)          # (S, C) for one batch element
    mean = jnp.mean(x, axis=0, keepdims=True)
    xc = x - mean
    var = jnp.mean(xc * xc, axis=0, keepdims=True)
    y = xc * lax.rsqrt(var + eps)
    y = _apply_act(y, act)
    if has_res:
        y = y + r_ref[...].astype(jnp.float32)
    y = _apply_act(y, post_act)
    o_ref[...] = y.astype(o_ref.dtype)


def instance_norm_cl(x, act="none", res=None, post_act="none"):
    # Per-batch spatial slab fits VMEM at these shapes (<=1 MiB).
    # TODO(synk): chunk the spatial axis (two-pass sum/sumsq) for very large volumes.
    B, D, H, W, C = x.shape
    S = D * H * W
    ins = [x.reshape(B, S, C)]
    in_specs = [pl.BlockSpec((None, S, C), lambda b: (b, 0, 0))]
    if res is not None:
        ins.append(res.reshape(B, S, C))
        in_specs.append(pl.BlockSpec((None, S, C), lambda b: (b, 0, 0)))
    out = pl.pallas_call(
        functools.partial(_inorm_kernel, eps=1e-5, act=act,
                          post_act=post_act, has_res=res is not None),
        out_shape=jax.ShapeDtypeStruct((B, S, C), x.dtype),
        grid=(B,),
        in_specs=in_specs,
        out_specs=pl.BlockSpec((None, S, C), lambda b: (b, 0, 0)),
        compiler_params=_params("parallel"),
    )(*ins)
    return out.reshape(B, D, H, W, C)


# --------------------------------------------------------------------------
# Direct 3x3x3 conv (stride 1, pad 1): one K=27*Cin bf16 dot per depth slice
# --------------------------------------------------------------------------
def _conv3_kernel(x_ref, w_ref, b_ref, o_ref, *, Dblk, H, W, Cinp):
    dstart = pl.program_id(1) * Dblk
    planes = [x_ref[dstart + j] for j in range(Dblk + 2)]    # (Hp, Wp, Cinp)
    for dd in range(Dblk):
        taps = []
        for kd in range(3):
            xk = planes[dd + kd]
            for kh in range(3):
                for kw in range(3):
                    taps.append(xk[kh:kh + H, kw:kw + W, :].reshape(H * W, Cinp))
        tap = jnp.concatenate(taps, axis=-1)                 # (H*W, 27*Cinp)
        acc = jnp.dot(tap, w_ref[...], preferred_element_type=jnp.float32)
        acc = acc + b_ref[...]
        o_ref[dd] = acc.astype(o_ref.dtype)


def _pick_dblk(D):
    if D % 4 == 0 and D > 4:
        return 4
    if D % 2 == 0 and D > 2:
        return 2
    return 1


def conv3x3(p, x):
    """k=3, stride 1, pad 1, channels-last.  Padded input slab is DMA'd once
    per batch (constant block index along the D grid axis)."""
    B, D, H, W, Cin = x.shape
    Cinp = p["cinp"]
    Cout = p["wm"].shape[1]
    xp = jnp.pad(x, ((0, 0), (1, 1), (1, 1), (1, 1), (0, Cinp - Cin)))
    Hp, Wp = H + 2, W + 2
    Dblk = _pick_dblk(D)
    out = pl.pallas_call(
        functools.partial(_conv3_kernel, Dblk=Dblk, H=H, W=W, Cinp=Cinp),
        out_shape=jax.ShapeDtypeStruct((B, D, H * W, Cout), x.dtype),
        grid=(B, D // Dblk),
        in_specs=[
            pl.BlockSpec((None, D + 2, Hp, Wp, Cinp), lambda b, d: (b, 0, 0, 0, 0)),
            pl.BlockSpec((27 * Cinp, Cout), lambda b, d: (0, 0)),
            pl.BlockSpec((1, Cout), lambda b, d: (0, 0)),
        ],
        out_specs=pl.BlockSpec((None, Dblk, H * W, Cout), lambda b, d: (b, d, 0, 0)),
        compiler_params=_params("parallel", "parallel"),
    )(xp, p["wm"], p["b"])
    return out.reshape(B, D, H, W, Cout)


# --------------------------------------------------------------------------
# RWKV time-mix / channel-mix fused projection kernels
# --------------------------------------------------------------------------
def _tmix_proj_kernel(x_ref, xx_ref, w_ref, k_ref, v_ref, r_ref, *, C):
    xcat = jnp.concatenate([x_ref[...], xx_ref[...]], axis=-1)     # (tm, 2C)
    acc = jnp.dot(xcat, w_ref[...], preferred_element_type=jnp.float32)
    k_ref[...] = acc[:, :C]
    v_ref[...] = acc[:, C:2 * C]
    r_ref[...] = jax.nn.sigmoid(acc[:, 2 * C:])


def pallas_tmix_proj(xf, xxf, wmix):
    M, C = xf.shape
    tm = _pick_tm(M)
    if M % tm:
        tm = M
    k, v, r = pl.pallas_call(
        functools.partial(_tmix_proj_kernel, C=C),
        out_shape=[jax.ShapeDtypeStruct((M, C), jnp.float32)] * 3,
        grid=(M // tm,),
        in_specs=[pl.BlockSpec((tm, C), lambda i: (i, 0)),
                  pl.BlockSpec((tm, C), lambda i: (i, 0)),
                  pl.BlockSpec((2 * C, 3 * C), lambda i: (0, 0))],
        out_specs=[pl.BlockSpec((tm, C), lambda i: (i, 0)) for _ in range(3)],
        compiler_params=_params("parallel"),
    )(xf, xxf, wmix)
    return k, v, r


def _cmix_proj_kernel(x_ref, xx_ref, w_ref, k_ref, r_ref, *, hidden):
    xcat = jnp.concatenate([x_ref[...], xx_ref[...]], axis=-1)
    acc = jnp.dot(xcat, w_ref[...], preferred_element_type=jnp.float32)
    kk = jnp.maximum(acc[:, :hidden], 0.0)
    k_ref[...] = (kk * kk).astype(k_ref.dtype)
    r_ref[...] = jax.nn.sigmoid(acc[:, hidden:])


def pallas_cmix_proj(xf, xxf, wmix, hidden):
    M, C = xf.shape
    tm = _pick_tm(M)
    if M % tm:
        tm = M
    k, r = pl.pallas_call(
        functools.partial(_cmix_proj_kernel, hidden=hidden),
        out_shape=[jax.ShapeDtypeStruct((M, hidden), jnp.bfloat16),
                   jax.ShapeDtypeStruct((M, C), jnp.float32)],
        grid=(M // tm,),
        in_specs=[pl.BlockSpec((tm, C), lambda i: (i, 0)),
                  pl.BlockSpec((tm, C), lambda i: (i, 0)),
                  pl.BlockSpec((2 * C, hidden + C), lambda i: (0, 0))],
        out_specs=[pl.BlockSpec((tm, hidden), lambda i: (i, 0)),
                   pl.BlockSpec((tm, C), lambda i: (i, 0))],
        compiler_params=_params("parallel"),
    )(xf, xxf, wmix)
    return k, r


def _gated_mm_kernel(g_ref, u_ref, w_ref, o_ref, *, kpad):
    lhs = (g_ref[...] * u_ref[...]).astype(jnp.bfloat16)     # sigmoid(r) * wkv
    if kpad:
        lhs = jnp.concatenate(
            [lhs, jnp.zeros((lhs.shape[0], kpad), jnp.bfloat16)], axis=-1)
    o_ref[...] = jnp.dot(lhs, w_ref[...],
                         preferred_element_type=jnp.float32).astype(o_ref.dtype)


def pallas_gated_matmul(g, u, w, kpad):
    M, C = g.shape
    N = w.shape[1]
    tm = _pick_tm(M)
    if M % tm:
        tm = M
    return pl.pallas_call(
        functools.partial(_gated_mm_kernel, kpad=kpad),
        out_shape=jax.ShapeDtypeStruct((M, N), jnp.bfloat16),
        grid=(M // tm,),
        in_specs=[pl.BlockSpec((tm, C), lambda i: (i, 0)),
                  pl.BlockSpec((tm, C), lambda i: (i, 0)),
                  pl.BlockSpec(w.shape, lambda i: (0, 0))],
        out_specs=pl.BlockSpec((tm, N), lambda i: (i, 0)),
        compiler_params=_params("parallel"),
    )(g, u, w)


def _scaled_mm_kernel(a_ref, w_ref, s_ref, o_ref):
    acc = jnp.dot(a_ref[...], w_ref[...], preferred_element_type=jnp.float32)
    o_ref[...] = (acc * s_ref[...]).astype(o_ref.dtype)      # r * (k @ Wv)


def pallas_scaled_matmul(a, w, s):
    M, K = a.shape
    N = w.shape[1]
    tm = _pick_tm(M)
    if M % tm:
        tm = M
    return pl.pallas_call(
        _scaled_mm_kernel,
        out_shape=jax.ShapeDtypeStruct((M, N), jnp.bfloat16),
        grid=(M // tm,),
        in_specs=[pl.BlockSpec((tm, K), lambda i: (i, 0)),
                  pl.BlockSpec((K, N), lambda i: (0, 0)),
                  pl.BlockSpec((tm, N), lambda i: (i, 0))],
        out_specs=pl.BlockSpec((tm, N), lambda i: (i, 0)),
        compiler_params=_params("parallel"),
    )(a, w, s)


# --------------------------------------------------------------------------
# WKV recurrence (RWKV-v4), f32 state, unrolled token loop
# --------------------------------------------------------------------------
def _wkv_kernel(k_ref, v_ref, w_ref, u_ref, o_ref, aa_ref, bb_ref, pp_ref,
                *, Tc, unroll):
    @pl.when(pl.program_id(0) == 0)
    def _():
        aa_ref[...] = jnp.zeros_like(aa_ref)
        bb_ref[...] = jnp.zeros_like(bb_ref)
        pp_ref[...] = jnp.full_like(pp_ref, -1e38)

    w = w_ref[...]
    u = u_ref[...]

    def body(t, carry):
        aa, bb, pp = carry
        kk = k_ref[t]                       # (B, C)
        vv = v_ref[t]
        ww = u + kk
        p = jnp.maximum(pp, ww)
        e1 = jnp.exp(pp - p)
        e2 = jnp.exp(ww - p)
        o_ref[t] = (e1 * aa + e2 * vv) / (e1 * bb + e2)   # exact div (numerics)
        ww2 = pp + w
        p2 = jnp.maximum(ww2, kk)
        e1b = jnp.exp(ww2 - p2)
        e2b = jnp.exp(kk - p2)
        return (e1b * aa + e2b * vv, e1b * bb + e2b, p2)

    aa, bb, pp = lax.fori_loop(0, Tc, body,
                               (aa_ref[...], bb_ref[...], pp_ref[...]),
                               unroll=unroll)
    aa_ref[...] = aa
    bb_ref[...] = bb
    pp_ref[...] = pp


def pallas_wkv(k, v, w, u):
    """k, v: (B, T, C) f32; w, u: (1, C) f32 (precomputed at init)."""
    B, T, C = k.shape
    Tc = min(256, T)
    while T % Tc:
        Tc -= 1
    unroll = 8 if Tc % 8 == 0 else 1
    kt = jnp.transpose(k, (1, 0, 2))        # (T, B, C); free copy for B == 1
    vt = jnp.transpose(v, (1, 0, 2))
    out = pl.pallas_call(
        functools.partial(_wkv_kernel, Tc=Tc, unroll=unroll),
        out_shape=jax.ShapeDtypeStruct((T, B, C), jnp.float32),
        grid=(T // Tc,),
        in_specs=[pl.BlockSpec((Tc, B, C), lambda t: (t, 0, 0)),
                  pl.BlockSpec((Tc, B, C), lambda t: (t, 0, 0)),
                  pl.BlockSpec((1, C), lambda t: (0, 0)),
                  pl.BlockSpec((1, C), lambda t: (0, 0))],
        out_specs=pl.BlockSpec((Tc, B, C), lambda t: (t, 0, 0)),
        scratch_shapes=[pltpu.VMEM((B, C), jnp.float32) for _ in range(3)],
        compiler_params=_params("arbitrary"),
    )(kt, vt, w, u)
    return jnp.transpose(out, (1, 0, 2))


# --------------------------------------------------------------------------
# Conv glue (channels-last NDHWC, bf16 activations)
# --------------------------------------------------------------------------
def conv1x1_nd(p, x, act="none", out_dtype=jnp.bfloat16):
    B, D, H, W, Cin = x.shape
    y = pallas_matmul(x.reshape(-1, Cin), p["wm"], p["b"], act=act,
                      out_dtype=out_dtype)
    return y.reshape(B, D, H, W, -1)


def conv_k2s2(p, x):
    # kernel 2, stride 2: exact space-to-depth reshape + Pallas matmul.
    B, D, H, W, Cin = x.shape
    xr = x.reshape(B, D // 2, 2, H // 2, 2, W // 2, 2, Cin)
    xr = xr.transpose(0, 1, 3, 5, 2, 4, 6, 7).reshape(-1, 8 * Cin)
    y = pallas_matmul(xr, p["wm"], p["b"])
    return y.reshape(B, D // 2, H // 2, W // 2, -1)


def conv7s2(p, x):
    # 7^3 stride-2 stem conv: XLA im2col feeding the Pallas matmul (runs once).
    B, D, H, W, Cin = x.shape
    k, s, pad = 7, 2, 3
    xp = jnp.pad(x, ((0, 0), (pad, pad), (pad, pad), (pad, pad), (0, 0)))
    Do = (D + 2 * pad - k) // s + 1
    Ho = (H + 2 * pad - k) // s + 1
    Wo = (W + 2 * pad - k) // s + 1
    cols = []
    for kd in range(k):
        for kh in range(k):
            for kw in range(k):
                cols.append(xp[:, kd:kd + (Do - 1) * s + 1:s,
                               kh:kh + (Ho - 1) * s + 1:s,
                               kw:kw + (Wo - 1) * s + 1:s, :])
    patches = jnp.concatenate(cols, axis=-1).reshape(-1, k ** 3 * Cin)
    y = pallas_matmul(patches, p["wm"], p["b"])
    return y.reshape(B, Do, Ho, Wo, -1)


def conv_transpose_cl(p, x):
    # kernel_size == stride, padding 0.
    B, D, H, W, Cin = x.shape
    k = p["k"]
    Cout = p["cout"]
    y = pallas_matmul(x.reshape(-1, Cin), p["wm"], p["bf"])
    y = y.reshape(B, D, H, W, k, k, k, Cout)
    y = y.transpose(0, 1, 4, 2, 5, 3, 6, 7).reshape(B, D * k, H * k, W * k, Cout)
    return y


# --------------------------------------------------------------------------
# Module forwards
# --------------------------------------------------------------------------
def gsc_forward(p, x):
    x_res = x
    x2 = instance_norm_cl(conv1x1_nd(p["proj3"], x), act="relu")
    x1 = instance_norm_cl(conv3x3(p["proj"], x), act="relu")
    x1 = instance_norm_cl(conv3x3(p["proj2"], x1), act="relu", res=x2)
    return instance_norm_cl(conv1x1_nd(p["proj4"], x1), act="relu", res=x_res)


def mlp_channel_forward(p, x):
    B, D, H, W, C = x.shape
    h = pallas_matmul(x.reshape(-1, C), p["w1"], p["b1"])
    # exact (erf) GELU kept in XLA to match nn.GELU(); tiny tensor here.
    # TODO(synk): fuse the GELU into the fc1 epilogue once erf-in-Mosaic is verified.
    h = jax.nn.gelu(h.astype(jnp.float32), approximate=False).astype(jnp.bfloat16)
    o = pallas_matmul(h, p["w2"], p["b2"])
    return o.reshape(B, D, H, W, -1)


def token_shift(x):
    return jnp.pad(x, ((0, 0), (1, 0), (0, 0)))[:, :-1, :]


def time_mix_forward(p, x):
    B, T, C = x.shape
    xx = token_shift(x)
    xf = x.reshape(-1, C)
    xxf = xx.reshape(-1, C)
    k, v, r = pallas_tmix_proj(xf, xxf, p["Wmix"])
    wkv = pallas_wkv(k.reshape(B, T, C), v.reshape(B, T, C), p["w"], p["u"])
    out = pallas_gated_matmul(r, wkv.reshape(-1, C), p["Wo"], p["wo_kpad"])
    return out.reshape(B, T, C)


def channel_mix_forward(p, x):
    B, T, C = x.shape
    xx = token_shift(x)
    xf = x.reshape(-1, C)
    xxf = xx.reshape(-1, C)
    ksq, r = pallas_cmix_proj(xf, xxf, p["Wmix"], p["hidden"])
    out = pallas_scaled_matmul(ksq, p["Wv"], r)
    return out.reshape(B, T, C)


# TODO(synk): the RWKV class body is not provided in the reference source; a
# standard RWKV-v4 block (LN -> TimeMix(WKV) residual, LN -> ChannelMix
# residual), stacked config.n_layer (= depths[i]) times, is used here.
def rwkv_forward(blocks, x):
    B, T, C = x.shape
    for blk in blocks:
        h = pallas_layernorm(x.reshape(-1, C), blk["ln1_g"], blk["ln1_b"]).reshape(B, T, C)
        x = x + time_mix_forward(blk["att"], h)
        h = pallas_layernorm(x.reshape(-1, C), blk["ln2_g"], blk["ln2_b"]).reshape(B, T, C)
        x = x + channel_mix_forward(blk["ffn"], h)
    return x


def rwkv_layer_forward(p, x):
    B = x.shape[0]
    C = x.shape[-1]
    T = 1
    for d in x.shape[1:-1]:
        T *= d
    x_skip = x
    xn = pallas_layernorm(x.reshape(-1, C), p["norm_g"], p["norm_b"]).reshape(B, T, C)
    xr = rwkv_forward(p["blocks"], xn)
    return xr.reshape(x.shape) + x_skip


def rwkv_encoder_forward(p, x):
    outs = []
    for i in range(4):
        if i == 0:
            x = conv7s2(p["stem_conv1"], x)
            x = instance_norm_cl(x)
            x = conv_k2s2(p["stem_conv2"], x)
        else:
            x = instance_norm_cl(x)
            x = conv_k2s2(p["down"][i - 1], x)
        x = gsc_forward(p["gscs"][i], x)
        x = rwkv_layer_forward(p["stages"][i], x)
        x_out = instance_norm_cl(x)                   # norm{i}
        x_out = mlp_channel_forward(p["mlps"][i], x_out)
        outs.append(x_out)
    return tuple(outs)


# MONAI UnetrBasicBlock(res_block=True) == UnetResBlock semantics
def unet_res_block_forward(p, x):
    residual = x
    out = instance_norm_cl(conv3x3(p["conv1"], x), act="lrelu")
    if "conv3" in p:
        residual = instance_norm_cl(conv1x1_nd(p["conv3"], x))
    # norm2 + residual add + trailing LeakyReLU(0.01) fused into one kernel
    return instance_norm_cl(conv3x3(p["conv2"], out), res=residual, post_act="lrelu")


def unetr_up_block_forward(p, x, skip):
    up = conv_transpose_cl(p["up"], x)
    cat = jnp.concatenate([up, skip], axis=-1)
    return unet_res_block_forward(p["res"], cat)


def segrwkv_forward(p, x_in):
    # module boundary is NCDHW (PyTorch); channels-last bf16 internally.
    x = jnp.transpose(x_in, (0, 2, 3, 4, 1)).astype(jnp.bfloat16)
    outs = rwkv_encoder_forward(p["vit"], x)
    enc1 = unet_res_block_forward(p["encoder1"], x)
    enc2 = unet_res_block_forward(p["encoder2"], outs[0])
    enc3 = unet_res_block_forward(p["encoder3"], outs[1])
    enc4 = unet_res_block_forward(p["encoder4"], outs[2])
    enc_hidden = unet_res_block_forward(p["encoder5"], outs[3])
    dec3 = unetr_up_block_forward(p["decoder5"], enc_hidden, enc4)
    dec2 = unetr_up_block_forward(p["decoder4"], dec3, enc3)
    dec1 = unetr_up_block_forward(p["decoder3"], dec2, enc2)
    dec0 = unetr_up_block_forward(p["decoder2"], dec1, enc1)
    out = unet_res_block_forward(p["decoder1"], dec0)
    B, D, H, W, C = out.shape
    logits = pallas_matmul(out.reshape(-1, C).astype(jnp.float32),
                           p["out"]["wm"], p["out"]["b"],
                           out_dtype=jnp.float32)       # head kept in f32
    logits = logits.reshape(B, D, H, W, -1)
    return jnp.transpose(logits, (0, 4, 1, 2, 3))


# --------------------------------------------------------------------------
# Deterministic parameter init (all fused / reshaped weights built here, once)
# --------------------------------------------------------------------------
class ParamGen:
    def __init__(self, seed):
        self._key = jax.random.PRNGKey(seed)

    def nrm(self, shape, scale=0.05):
        self._key, k = jax.random.split(self._key)
        return scale * jax.random.normal(k, shape, jnp.float32)


def prep_conv3x3(pg, cin, cout):
    w = pg.nrm((cout, cin, 3, 3, 3))
    b = pg.nrm((cout,), 0.02)
    cinp = 8 if cin < 8 else cin
    wm = jnp.transpose(w, (2, 3, 4, 1, 0))
    wm = jnp.pad(wm, ((0, 0), (0, 0), (0, 0), (0, cinp - cin), (0, 0)))
    return {"wm": wm.reshape(27 * cinp, cout).astype(jnp.bfloat16),
            "b": b.reshape(1, cout).astype(jnp.float32),
            "cinp": cinp}


def prep_conv1x1(pg, cin, cout, dtype=jnp.bfloat16):
    w = pg.nrm((cout, cin, 1, 1, 1))
    b = pg.nrm((cout,), 0.02)
    return {"wm": jnp.transpose(w.reshape(cout, cin)).astype(dtype),
            "b": b.reshape(1, cout).astype(jnp.float32)}


def prep_conv_k2s2(pg, cin, cout):
    w = pg.nrm((cout, cin, 2, 2, 2))
    b = pg.nrm((cout,), 0.02)
    wm = jnp.transpose(w, (2, 3, 4, 1, 0)).reshape(8 * cin, cout)
    return {"wm": wm.astype(jnp.bfloat16),
            "b": b.reshape(1, cout).astype(jnp.float32)}


def prep_conv7s2(pg, cin, cout):
    w = pg.nrm((cout, cin, 7, 7, 7))
    b = pg.nrm((cout,), 0.02)
    wm = jnp.transpose(w, (2, 3, 4, 1, 0)).reshape(343 * cin, cout)
    return {"wm": wm.astype(jnp.bfloat16),
            "b": b.reshape(1, cout).astype(jnp.float32)}


def prep_convT(pg, cin, cout, k):
    w = pg.nrm((cin, cout, k, k, k))
    b = pg.nrm((cout,), 0.02)
    wm = jnp.transpose(w, (0, 2, 3, 4, 1)).reshape(cin, k ** 3 * cout)
    return {"wm": wm.astype(jnp.bfloat16),
            "bf": jnp.tile(b, (k ** 3,)).reshape(1, -1).astype(jnp.float32),
            "k": k, "cout": cout}


def prep_time_mix(pg, C):
    decay = pg.nrm((C,), 0.5)
    first = pg.nrm((C,), 0.5)
    mk = jax.nn.sigmoid(pg.nrm((C,), 1.0))
    mv = jax.nn.sigmoid(pg.nrm((C,), 1.0))
    mr = jax.nn.sigmoid(pg.nrm((C,), 1.0))
    Wk, Wv, Wr, Wo = (pg.nrm((C, C)) for _ in range(4))
    top = jnp.concatenate([mk[:, None] * Wk, mv[:, None] * Wv, mr[:, None] * Wr], axis=1)
    bot = jnp.concatenate([(1 - mk)[:, None] * Wk, (1 - mv)[:, None] * Wv,
                           (1 - mr)[:, None] * Wr], axis=1)
    kpad = max(0, 8 - C)
    return {"Wmix": jnp.concatenate([top, bot], axis=0).astype(jnp.bfloat16),
            "Wo": jnp.pad(Wo, ((0, kpad), (0, 0))).astype(jnp.bfloat16),
            "wo_kpad": kpad,
            "w": (-jnp.exp(decay)).reshape(1, C).astype(jnp.float32),
            "u": first.reshape(1, C).astype(jnp.float32)}


def prep_channel_mix(pg, C):
    mk = jax.nn.sigmoid(pg.nrm((C,), 1.0))
    mr = jax.nn.sigmoid(pg.nrm((C,), 1.0))
    Wk = pg.nrm((C, 4 * C))
    Wr = pg.nrm((C, C))
    Wv = pg.nrm((4 * C, C))
    top = jnp.concatenate([mk[:, None] * Wk, mr[:, None] * Wr], axis=1)
    bot = jnp.concatenate([(1 - mk)[:, None] * Wk, (1 - mr)[:, None] * Wr], axis=1)
    return {"Wmix": jnp.concatenate([top, bot], axis=0).astype(jnp.bfloat16),
            "Wv": Wv.astype(jnp.bfloat16), "hidden": 4 * C}


def prep_mlp(pg, C):
    return {"w1": pg.nrm((C, 2 * C)).astype(jnp.bfloat16),
            "b1": pg.nrm((2 * C,), 0.02).astype(jnp.float32),
            "w2": pg.nrm((2 * C, C)).astype(jnp.bfloat16),
            "b2": pg.nrm((C,), 0.02).astype(jnp.float32)}


def init_rwkv_layer(pg, C, n_layer):
    def ln():
        return ((1.0 + pg.nrm((C,), 0.02)).reshape(1, C),
                pg.nrm((C,), 0.02).reshape(1, C))

    def blk():
        g1, b1 = ln()
        g2, b2 = ln()
        return {"ln1_g": g1, "ln1_b": b1, "ln2_g": g2, "ln2_b": b2,
                "att": prep_time_mix(pg, C), "ffn": prep_channel_mix(pg, C)}

    g, b = ln()
    return {"norm_g": g, "norm_b": b, "blocks": [blk() for _ in range(n_layer)]}


def init_segrwkv(pg, in_chans, out_chans, depths, feat_size, hidden_size):
    dims = feat_size
    vit = {
        "stem_conv1": prep_conv7s2(pg, in_chans, dims[0]),
        "stem_conv2": prep_conv_k2s2(pg, dims[0], dims[0]),
        "down": [prep_conv_k2s2(pg, dims[i], dims[i + 1]) for i in range(3)],
        "gscs": [{"proj": prep_conv3x3(pg, c, c), "proj2": prep_conv3x3(pg, c, c),
                  "proj3": prep_conv1x1(pg, c, c), "proj4": prep_conv1x1(pg, c, c)}
                 for c in dims],
        "stages": [init_rwkv_layer(pg, dims[i], depths[i]) for i in range(4)],
        "mlps": [prep_mlp(pg, c) for c in dims],
    }

    def resblock(cin, cout):
        d = {"conv1": prep_conv3x3(pg, cin, cout),
             "conv2": prep_conv3x3(pg, cout, cout)}
        if cin != cout:
            d["conv3"] = prep_conv1x1(pg, cin, cout)
        return d

    def upblock(cin, cout, k):
        return {"up": prep_convT(pg, cin, cout, k),
                "res": resblock(cout + cout, cout)}

    return {
        "vit": vit,
        "encoder1": resblock(in_chans, dims[0]),
        "encoder2": resblock(dims[0], dims[1]),
        "encoder3": resblock(dims[1], dims[2]),
        "encoder4": resblock(dims[2], dims[3]),
        "encoder5": resblock(dims[3], hidden_size),
        "decoder5": upblock(hidden_size, dims[3], 2),
        "decoder4": upblock(dims[3], dims[2], 2),
        "decoder3": upblock(dims[2], dims[1], 2),
        "decoder2": upblock(dims[1], dims[0], 4),
        "decoder1": resblock(dims[0], dims[0]),
        "out": prep_conv1x1(pg, dims[0], out_chans, dtype=jnp.float32),
    }


# --------------------------------------------------------------------------
if __name__ == "__main__":
    B, in_chans, S = 1, 1, 32        # 32^3 is the minimum spatial size for 4 stages
    out_chans = 2
    depths = (1, 1, 1, 1)
    feat_size = (4, 8, 16, 32)
    hidden_size = 48

    pg = ParamGen(0)
    params = init_segrwkv(pg, in_chans, out_chans, depths, feat_size, hidden_size)

    x_in = jax.random.normal(jax.random.PRNGKey(0), (B, in_chans, S, S, S),
                             jnp.float32)

    out = segrwkv_forward(params, x_in)
    out = jax.block_until_ready(out)

    assert out.shape == (B, out_chans, S, S, S), out.shape
    assert bool(jnp.all(jnp.isfinite(out)))
    print("KERNEL_OK")
</pallas_src>

<mosaic_0001>
module attributes {stable_mosaic.version = 11 : i64} {
  func.func @_mm_kernel(%arg0: i32, %arg1: memref<512x343xbf16, #tpu.memory_space<vmem>>, %arg2: memref<343x4xbf16, #tpu.memory_space<vmem>>, %arg3: memref<1x4xf32, #tpu.memory_space<vmem>>, %arg4: memref<512x4xbf16, #tpu.memory_space<vmem>>) attributes {dimension_semantics = [#tpu.dimension_semantics<parallel>], iteration_bounds = array<i64: 8>, scalar_prefetch = 0 : i64, scratch_operands = 0 : i64, tpu.core_type = #tpu.core_type<tc>, window_params = [{transform_indices = @transform_0, window_bounds = array<i64: 512, 343>}, {pipeline_mode = #tpu.pipeline_mode<synchronous>, transform_indices = @transform_1, window_bounds = array<i64: 343, 4>}, {pipeline_mode = #tpu.pipeline_mode<synchronous>, transform_indices = @transform_2, window_bounds = array<i64: 1, 4>}, {transform_indices = @transform_3, window_bounds = array<i64: 512, 4>}]} {
    %c0 = arith.constant 0 : index
    %c0_0 = arith.constant 0 : index
    %0 = vector.load %arg1[%c0, %c0_0] : memref<512x343xbf16, #tpu.memory_space<vmem>>, vector<512x343xbf16>
    %c0_1 = arith.constant 0 : index
    %c0_2 = arith.constant 0 : index
    %1 = vector.load %arg2[%c0_1, %c0_2] : memref<343x4xbf16, #tpu.memory_space<vmem>>, vector<343x4xbf16>
    %cst = arith.constant dense<0.000000e+00> : vector<512x4xf32>
    %2 = tpu.matmul %0, %1, %cst {dimension_numbers = #tpu.dot_dimension_numbers<[1], [0], [0], [1], [0, 0, 1, 1], [], []>} : vector<512x343xbf16>, vector<343x4xbf16>, vector<512x4xf32> -> vector<512x4xf32>
    %c0_3 = arith.constant 0 : index
    %c0_4 = arith.constant 0 : index
    %3 = vector.load %arg3[%c0_3, %c0_4] : memref<1x4xf32, #tpu.memory_space<vmem>>, vector<1x4xf32>
    %4 = vector.broadcast %3 : vector<1x4xf32> to vector<512x4xf32>
    %5 = arith.addf %2, %4 : vector<512x4xf32>
    %6 = arith.truncf %5 : vector<512x4xf32> to vector<512x4xbf16>
    %c0_5 = arith.constant 0 : index
    %c0_6 = arith.constant 0 : index
    %7 = vector.load %arg4[%c0_5, %c0_6] : memref<512x4xbf16, #tpu.memory_space<vmem>>, vector<512x4xbf16>
    tpu.vector_store %arg4[%c0_5, %c0_6], %6 {strides = array<i32>} : memref<512x4xbf16, #tpu.memory_space<vmem>>, vector<512x4xbf16>,
    return
  }
  func.func @transform_0(%arg0: i32) -> (i32, i32) {
    %c0_i32 = arith.constant 0 : i32
    %c0_i32_0 = arith.constant 0 : i32
    return %arg0, %c0_i32 : i32, i32
  }
  func.func @transform_1(%arg0: i32) -> (i32, i32) {
    %c0_i32 = arith.constant 0 : i32
    %c0_i32_0 = arith.constant 0 : i32
    %c0_i32_1 = arith.constant 0 : i32
    return %c0_i32, %c0_i32_0 : i32, i32
  }
  func.func @transform_2(%arg0: i32) -> (i32, i32) {
    %c0_i32 = arith.constant 0 : i32
    %c0_i32_0 = arith.constant 0 : i32
    %c0_i32_1 = arith.constant 0 : i32
    return %c0_i32, %c0_i32_0 : i32, i32
  }
  func.func @transform_3(%arg0: i32) -> (i32, i32) {
    %c0_i32 = arith.constant 0 : i32
    %c0_i32_0 = arith.constant 0 : i32
    return %arg0, %c0_i32 : i32, i32
  }
}

</mosaic_0001>

<bundles_post_ra>
// kernel: tpu_custom_call.1
= control target key start
LH: loop header
LB: loop body
LE: loop exit
PB: predicated region body
PF: predicated region fallthrough
CT: control target
= control target key end

     0   :  { %s2449_s12 = smov 0   ;;  %s3102_s0 = inlined_call_operand.vmem [shape: bf16[4096,343], index: 0, kind: input, shape index: {}]   ;;  %s3103_s1 = inlined_call_operand.vmem [shape: bf16[343,4], index: 1, kind: input, shape index: {}]   ;;  %s3104_s2 = inlined_call_operand.vmem [shape: f32[1,4], index: 2, kind: input, shape index: {}]   ;;  %s3105_s3 = inlined_call_operand.vmem [shape: bf16[4096,4], index: 3, kind: output, shape index: {}]  }
   0x1 LB: > { %s1758_s13 = sadd.s32 4294967295, %s2426_s12   ;;  %p1762_p0 = scmp.ge.s32.totalorder %s2426_s12, 1  ;;  %s2426_s12 = sphi %s2449_s12, %s13_s12  }
   0x2   : > { %p139_p1 = scmp.lt.s32.totalorder %s2426_s12, 9 }
   0x4   : > { %p140_p2 = pnand %p1762_p0, %p139_p1 }
   0x5   : > { %s1763_s26 = sshll.u32 (!%p140_p2), %s1758_s13, 6 }
   0x6   : > { %143 = sbr.rel (%p140_p2) target bundleno = 570 (0x23a), region = 32  ;;  %p165_p3 = scmp.lt.s32.totalorder (!%p140_p2), %s1763_s26, 511 }
   0xb   : > { %v2372_v0 = vld [vmem:[%s3103_s1 + $0x38] sm:$0xff]  ;;  %vm1059_vm0 = vcmask 1042432   ;;  %vm1060_vm1 = vcmask 1043456   ;;  %v348_v2 = vld [vmem:[%s3103_s1 + $0xa8] sm:$0xf]  ;;  %v2428_v3 = vmov 65535  }
   0xc   : > { %v2463_v1 = vld [vmem:[%s3103_s1 + $0x78] sm:$0xff]  ;;  %v1061_v4 = vsel %vm1059_vm0, 4294967295, %v2428_v3  ;;  %1066 = vmatpush.bf16.msra.mxu0 %v2372_v0  ;;  %2386 = vmatpush.bf16.msra.mxu3 %v2372_v0  ;;  %v2371_v5 = vld [vmem:[%s3103_s1 + $0x30] sm:$0xff]  ;;  %v918_v6 = vunpack.c.l.b16 %v348_v2  ;;  %v2370_v11 = vld [vmem:[%s3103_s1 + $0x28] sm:$0xff]  ;;  %s3107_s26 = smov (!%p165_p3, %s1763_s26), 511  ;;  %vm962_vm2 = vcmask 711680  }
   0xd   : > { %1235 = vmatpush.bf16.msra.mxu1 %v2463_v1  ;;  %v1062_v7 = vsel %vm1060_vm1, %v1061_v4, 0  ;;  %v2475_v8 = vld [vmem:[%s3103_s1 + $0x70] sm:$0xff]  ;;  %v2486_v12 = vld [vmem:[%s3103_s1 + $0x68] sm:$0xff]  ;;  %v2492_v13 = vld [vmem:[%s3103_s1 + $0xa0] sm:$0xff]  ;;  %s2408_s17 = smul.u32 12, %s3107_s26  ;;  %s1766_s14 = sshll.u32 %s3107_s26, 2 }
   0xe   : > { %v940_v9 = vpack.c.b16 %v918_v6, %v918_v6  ;;  %v2369_v14 = vld [vmem:[%s3103_s1 + $0x20] sm:$0xff]  ;;  %v2507_v16 = vld [vmem:[%s3103_s1 + $0x98] sm:$0xff]  ;;  %v2522_v19 = vld [vmem:[%s3103_s1 + $0x90] sm:$0xff]  ;;  %vm1637_vm3 = vcmask 27648  }
   0xf   : > { %v2501_v15 = vld [vmem:[%s3103_s1 + $0x60] sm:$0xff]  ;;  %v2368_v17 = vld [vmem:[%s3103_s1 + $0x18] sm:$0xff]  ;;  %v2367_v20 = vld [vmem:[%s3103_s1 + $0x10] sm:$0xff]  ;;  %s2540_s27 = scalar_lea.vmem %s3102_s0, %s2408_s17  ;;  %s2662_s17 = scalar_lea.vmem %s3105_s3, %s1766_s14 }
  0x10   : > { %1067 = vmatpush.bf16.msra.mxu0 %v2371_v5  ;;  %2387 = vmatpush.bf16.msra.mxu3 %v2371_v5  ;;  %v2477_v10 = vand.u32 %v1062_v7, %v940_v9  ;;  %v2376_v18 = vld [vmem:[%s3103_s1 + $0x58] sm:$0xff]  ;;  %v2375_v21 = vld [vmem:[%s3103_s1 + $0x50] sm:$0xff]  ;;  %v2535_v22 = vld [vmem:[%s3103_s1 + $0x88] sm:$0xff] }
  0x11   : > { %1236 = vmatpush.bf16.msra.mxu1 %v2475_v8  ;;  %v2366_v23 = vld [vmem:[%s3103_s1 + $0x8] sm:$0xff]  ;;  %v2552_v25 = vld [vmem:[%s3103_s1 + $0x80] sm:$0xff]  ;;  %v2271_v27 = vld [vmem:[%s2540_s27 + $0x10] sm:$0xf0] }
  0x12   : > { %1406 = vmatpush.bf16.msra.mxu2 %v2477_v10  ;;  %v2374_v24 = vld [vmem:[%s3103_s1 + $0x48] sm:$0xff]  ;;  %v2365_v28 = vld [vmem:[%s3103_s1] sm:$0xff]  ;;  %v1771_v36 = vld [vmem:[%s2540_s27 + $0xc] sm:$0xf0] }
  0x13   : > { %v1777_v26 = vld [vmem:[%s2540_s27 + $0x8] sm:$0xf]  ;;  %v1769_v29 = vld [vmem:[%s2540_s27] sm:$0xf]  ;;  %v2270_v30 = vld [vmem:[%s2540_s27 + $0x8] sm:$0xf0] }
  0x14   : > { %1068 = vmatpush.bf16.msra.mxu0 %v2370_v11  ;;  %2388 = vmatpush.bf16.msra.mxu3 %v2370_v11  ;;  %v2057_v31 = vld [vmem:[%s2540_s27 + $0x240] sm:$0xf]  ;;  %v2342_v32 = vld [vmem:[%s2540_s27 + $0x248] sm:$0xf0]  ;;  %v1778_v33 = vor.u32 %v2271_v27, %v1777_v26  ;;  %v2269_v35 = vld [vmem:[%s2540_s27 + $0x4] sm:$0xf]  ;;  %v1770_v37 = vor.u32 %v2270_v30, %v1769_v29 }
  0x15   : > { %1237 = vmatpush.bf16.msra.mxu1 %v2486_v12  ;;  %v2373_v34 = vld [vmem:[%s3103_s1 + $0x40] sm:$0xff]  ;;  %v2058_v38 = vor.u32 %v2342_v32, %v2057_v31  ;;  %v1774_v39 = vor.u32 %v2269_v35, %v1771_v36  ;;  %v2274_v41 = vld [vmem:[%s2540_s27 + $0x28] sm:$0xf0]  ;;  %v1781_v42 = vld [vmem:[%s2540_s27 + $0x18] sm:$0xf] }
  0x16   : > { %1407 = vmatpush.bf16.msra.mxu2 %v2492_v13  ;;  %v1789_v40 = vld [vmem:[%s2540_s27 + $0x20] sm:$0xf]  ;;  %v2273_v43 = vld [vmem:[%s2540_s27 + $0x20] sm:$0xf0]  ;;  %v2069_v44 = vld [vmem:[%s2540_s27 + $0x258] sm:$0xf] }
  0x17   : > { %v2345_v45 = vld [vmem:[%s2540_s27 + $0x260] sm:$0xf0]  ;;  %v1790_v46 = vor.u32 %v2274_v41, %v1789_v40  ;;  %v2272_v47 = vld [vmem:[%s2540_s27 + $0x1c] sm:$0xf]  ;;  %v1783_v48 = vld [vmem:[%s2540_s27 + $0x24] sm:$0xf0]  ;;  %v1782_v49 = vor.u32 %v2273_v43, %v1781_v42 }
  0x18   : > { %1069 = vmatpush.bf16.msra.mxu0 %v2369_v14  ;;  %2389 = vmatpush.bf16.msra.mxu3 %v2369_v14  ;;  %v2070_v50 = vor.u32 %v2345_v45, %v2069_v44  ;;  %v1786_v51 = vor.u32 %v2272_v47, %v1783_v48  ;;  %v1801_v52 = vld [vmem:[%s2540_s27 + $0x38] sm:$0xf]  ;;  %v2277_v53 = vld [vmem:[%s2540_s27 + $0x40] sm:$0xf0]  ;;  %v1793_v54 = vld [vmem:[%s2540_s27 + $0x30] sm:$0xf] }
  0x19   : > { %1238 = vmatpush.bf16.msra.mxu1 %v2501_v15  ;;  %v2276_v55 = vld [vmem:[%s2540_s27 + $0x38] sm:$0xf0]  ;;  %v2081_v56 = vld [vmem:[%s2540_s27 + $0x270] sm:$0xf]  ;;  %v1802_v58 = vor.u32 %v2277_v53, %v1801_v52  ;;  %v2275_v59 = vld [vmem:[%s2540_s27 + $0x34] sm:$0xf] }
  0x1a   : > { %1408 = vmatpush.bf16.msra.mxu2 %v2507_v16  ;;  %v2348_v57 = vld [vmem:[%s2540_s27 + $0x278] sm:$0xf0]  ;;  %v1795_v60 = vld [vmem:[%s2540_s27 + $0x3c] sm:$0xf0]  ;;  %v1794_v61 = vor.u32 %v2276_v55, %v1793_v54  ;;  %v1813_v0 = vld [vmem:[%s2540_s27 + $0x50] sm:$0xf] }
  0x1b   : > { %v2082_v62 = vor.u32 %v2348_v57, %v2081_v56  ;;  %v1798_v63 = vor.u32 %v2275_v59, %v1795_v60  ;;  %v1805_v2 = vld [vmem:[%s2540_s27 + $0x48] sm:$0xf]  ;;  %v2279_v3 = vld [vmem:[%s2540_s27 + $0x50] sm:$0xf0]  ;;  %v2278_v7 = vld [vmem:[%s2540_s27 + $0x4c] sm:$0xf] }
  0x1c   : > { %1070 = vmatpush.bf16.msra.mxu0 %v2368_v17  ;;  %2390 = vmatpush.bf16.msra.mxu3 %v2368_v17  ;;  %v2093_v4 = vld [vmem:[%s2540_s27 + $0x288] sm:$0xf]  ;;  %v2351_v5 = vld [vmem:[%s2540_s27 + $0x290] sm:$0xf0]  ;;  %v1806_v9 = vor.u32 %v2279_v3, %v1805_v2  ;;  %v1817_v14 = vld [vmem:[%s2540_s27 + $0x60] sm:$0xf] }
  0x1d   : > { %1239 = vmatpush.bf16.msra.mxu1 %v2376_v18  ;;  %v2354_v17 = vld [vmem:[%s2540_s27 + $0x2a8] sm:$0xf0]  ;;  %v1829_v26 = vld [vmem:[%s2540_s27 + $0x78] sm:$0xf]  ;;  %v2285_v27 = vld [vmem:[%s2540_s27 + $0x80] sm:$0xf0] }
  0x1e   : > { %1409 = vmatpush.bf16.msra.mxu2 %v2522_v19  ;;  %v2357_v29 = vld [vmem:[%s2540_s27 + $0x2c0] sm:$0xf0]  ;;  %v2284_v31 = vld [vmem:[%s2540_s27 + $0x7c] sm:$0xf]  ;;  %v1831_v32 = vld [vmem:[%s2540_s27 + $0x84] sm:$0xf0] }
  0x1f   : > { %v1834_v35 = vor.u32 %v2284_v31, %v1831_v32  ;;  %v1849_v36 = vld [vmem:[%s2540_s27 + $0x98] sm:$0xf]  ;;  %v2129_v40 = vld [vmem:[%s2540_s27 + $0x2d0] sm:$0xf]  ;;  %v2360_v41 = vld [vmem:[%s2540_s27 + $0x2d8] sm:$0xf0] }
  0x20   : > { %1071 = vmatpush.bf16.msra.mxu0 %v2367_v20  ;;  %2391 = vmatpush.bf16.msra.mxu3 %v2367_v20  ;;  %v1819_v20 = vld [vmem:[%s2540_s27 + $0x6c] sm:$0xf0]  ;;  %v2287_v43 = vld [vmem:[%s2540_s27 + $0x94] sm:$0xf]  ;;  %v1843_v44 = vld [vmem:[%s2540_s27 + $0x9c] sm:$0xf0] }
  0x21   : > { %1240 = vmatpush.bf16.msra.mxu1 %v2375_v21  ;;  %v1846_v47 = vor.u32 %v2287_v43, %v1843_v44  ;;  %v1861_v48 = vld [vmem:[%s2540_s27 + $0xb0] sm:$0xf]  ;;  %v2141_v52 = vld [vmem:[%s2540_s27 + $0x2e8] sm:$0xf]  ;;  %v2363_v53 = vld [vmem:[%s2540_s27 + $0x2f0] sm:$0xf0] }
  0x22   : > { %1410 = vmatpush.bf16.msra.mxu2 %v2535_v22  ;;  %v2290_v55 = vld [vmem:[%s2540_s27 + $0xac] sm:$0xf]  ;;  %v1855_v56 = vld [vmem:[%s2540_s27 + $0xb4] sm:$0xf0]  ;;  %v1873_v60 = vld [vmem:[%s2540_s27 + $0xc8] sm:$0xf] }
  0x23   : > { %v1858_v59 = vor.u32 %v2290_v55, %v1855_v56  ;;  %v2652_v3 = vld [vmem:[%s3104_s2] ss:$0 sm:$0xff]  ;;  %v1879_v31 = vld [vmem:[%s2540_s27 + $0xe4] sm:$0xf0] }
  0x24   : > { %1072 = vmatpush.bf16.msra.mxu0 %v2366_v23  ;;  %2392 = vmatpush.bf16.msra.mxu3 %v2366_v23  ;;  %v2083_v55 = vld [vmem:[%s2540_s27 + $0x27c] sm:$0xf0] }
  0x25   : > { %1241 = vmatpush.bf16.msra.mxu1 %v2374_v24 }
  0x26   : > { %1411 = vmatpush.bf16.msra.mxu2 %v2552_v25 }
  0x28   : > { %1073 = vmatpush.bf16.msra.mxu0 %v2365_v28  ;;  %2393 = vmatpush.bf16.msra.mxu3 %v2365_v28  ;;  %v2117_v28 = vld [vmem:[%s2540_s27 + $0x2b8] sm:$0xf] }
  0x29   : > { %2235 = vmatmul.msk.bf16.vlgmr.msra.gmra.mxu2 %vm962_vm2, %v1778_v33  ;;  %1242 = vmatpush.bf16.msra.mxu1 %v2373_v34  ;;  %v1830_v33 = vor.u32 %v2285_v27, %v1829_v26  ;;  %v2344_v26 = vld [vmem:[%s2540_s27 + $0x25c] sm:$0xf]  ;;  %v2071_v27 = vld [vmem:[%s2540_s27 + $0x264] sm:$0xf0] }
  0x2b   : > { %1074 = vmatmul.bf16.vlgmr.msra.gmra.mxu0 %v1770_v37  ;;  %1194 = vmatmul.bf16.vlgmr.msra.gmra.mxu3 %v2058_v38  ;;  %v2289_v37 = vld [vmem:[%s2540_s27 + $0xa0] sm:$0xf0]  ;;  %v1841_v38 = vld [vmem:[%s2540_s27 + $0x90] sm:$0xf] }
  0x2c   : > { %2394 = vmatpush.bf16.msrb.mxu3 %v2463_v1  ;;  %1243 = vmatmul.bf16.vlgmr.msra.gmra.mxu1 %v1774_v39  ;;  %v2280_v1 = vld [vmem:[%s2540_s27 + $0x58] sm:$0xf0]  ;;  %v1850_v42 = vor.u32 %v2289_v37, %v1849_v36 }
  0x2d   : > { %v1814_v6 = vor.u32 %v2280_v1, %v1813_v0  ;;  %v2288_v39 = vld [vmem:[%s2540_s27 + $0x98] sm:$0xf0]  ;;  %v2341_v0 = vld [vmem:[%s2540_s27 + $0x244] sm:$0xf]  ;;  %v2059_v1 = vld [vmem:[%s2540_s27 + $0x24c] sm:$0xf0] }
  0x2e   : > { %v1842_v45 = vor.u32 %v2288_v39, %v1841_v38 }
  0x30   : > { %2395 = vmatpush.bf16.msrb.mxu3 %v2475_v8  ;;  %v1807_v8 = vld [vmem:[%s2540_s27 + $0x54] sm:$0xf0] }
  0x31   : > { %v1810_v11 = vor.u32 %v2278_v7, %v1807_v8  ;;  %v2062_v7 = vor.u32 %v2341_v0, %v2059_v1 }
  0x34   : > { %2396 = vmatpush.bf16.msrb.mxu3 %v2486_v12  ;;  %v1825_v12 = vld [vmem:[%s2540_s27 + $0x68] sm:$0xf] }
  0x38   : > { %2397 = vmatpush.bf16.msrb.mxu3 %v2501_v15  ;;  %v2282_v15 = vld [vmem:[%s2540_s27 + $0x68] sm:$0xf0] }
  0x39   : > { %2236 = vmatmul.msk.bf16.gmra.mxu2 %vm962_vm2, %v1790_v46  ;;  %v2130_v46 = vor.u32 %v2360_v41, %v2129_v40 }
  0x3b   : > { %1079 = vmatmul.bf16.gmra.mxu0 %v1782_v49  ;;  %1199 = vmatmul.bf16.gmra.mxu3 %v2070_v50  ;;  %v2292_v49 = vld [vmem:[%s2540_s27 + $0xb8] sm:$0xf0]  ;;  %v1853_v50 = vld [vmem:[%s2540_s27 + $0xa8] sm:$0xf] }
  0x3c   : > { %2398 = vmatpush.bf16.msrb.mxu3 %v2376_v18  ;;  %1248 = vmatmul.bf16.gmra.mxu1 %v1786_v51  ;;  %v2291_v51 = vld [vmem:[%s2540_s27 + $0xb0] sm:$0xf0]  ;;  %v1862_v54 = vor.u32 %v2292_v49, %v1861_v48  ;;  %v1897_v48 = vld [vmem:[%s2540_s27 + $0xf8] sm:$0xf]  ;;  %v2301_v49 = vld [vmem:[%s2540_s27 + $0x100] sm:$0xf0] }
  0x3d   : > { %v1854_v57 = vor.u32 %v2291_v51, %v1853_v50  ;;  %v1889_v51 = vld [vmem:[%s2540_s27 + $0xf0] sm:$0xf] }
  0x40   : > { %2399 = vmatpush.bf16.msrb.mxu3 %v2375_v21  ;;  %v1818_v21 = vor.u32 %v2282_v15, %v1817_v14 }
  0x44   : > { %2400 = vmatpush.bf16.msrb.mxu3 %v2374_v24  ;;  %v1837_v24 = vld [vmem:[%s2540_s27 + $0x80] sm:$0xf] }
  0x48   : > { %2401 = vmatpush.bf16.msrb.mxu3 %v2373_v34  ;;  %v2118_v34 = vor.u32 %v2357_v29, %v2117_v28 }
  0x49   : > { %2237 = vmatmul.msk.bf16.gmra.mxu2 %vm962_vm2, %v1802_v58  ;;  %v2142_v58 = vor.u32 %v2363_v53, %v2141_v52  ;;  %v2300_v53 = vld [vmem:[%s2540_s27 + $0xf8] sm:$0xf0] }
  0x4b   : > { %1084 = vmatmul.bf16.gmra.mxu0 %v1794_v61  ;;  %1204 = vmatmul.bf16.gmra.mxu3 %v2082_v62  ;;  %v2295_v61 = vld [vmem:[%s2540_s27 + $0xd0] sm:$0xf0]  ;;  %v1865_v62 = vld [vmem:[%s2540_s27 + $0xc0] sm:$0xf] }
  0x4c   : > { %2402 = vmatpush.bf16.msra.mxu3 %v2477_v10  ;;  %1253 = vmatmul.bf16.gmra.mxu1 %v1798_v63  ;;  %v2094_v10 = vor.u32 %v2351_v5, %v2093_v4  ;;  %v2294_v63 = vld [vmem:[%s2540_s27 + $0xc8] sm:$0xf0]  ;;  %v1874_v2 = vor.u32 %v2295_v61, %v1873_v60  ;;  %v2293_v4 = vld [vmem:[%s2540_s27 + $0xc4] sm:$0xf]  ;;  %v1867_v5 = vld [vmem:[%s2540_s27 + $0xcc] sm:$0xf0] }
  0x50   : > { %2403 = vmatpush.bf16.msra.mxu3 %v2492_v13  ;;  %v2283_v13 = vld [vmem:[%s2540_s27 + $0x70] sm:$0xf0] }
  0x51   : > { %v1826_v18 = vor.u32 %v2283_v13, %v1825_v12 }
  0x54   : > { %2404 = vmatpush.bf16.msra.mxu3 %v2507_v16  ;;  %v2105_v16 = vld [vmem:[%s2540_s27 + $0x2a0] sm:$0xf] }
  0x58   : > { %2405 = vmatpush.bf16.msra.mxu3 %v2522_v19  ;;  %v2281_v19 = vld [vmem:[%s2540_s27 + $0x64] sm:$0xf] }
  0x59   : > { %2238 = vmatmul.msk.bf16.gmra.mxu2 %vm962_vm2, %v1814_v6  ;;  %v1822_v23 = vor.u32 %v2281_v19, %v1819_v20  ;;  %v1866_v6 = vor.u32 %v2294_v63, %v1865_v62  ;;  %v1885_v20 = vld [vmem:[%s2540_s27 + $0xe0] sm:$0xf]  ;;  %v1890_v62 = vor.u32 %v2300_v53, %v1889_v51  ;;  %v2107_v51 = vld [vmem:[%s2540_s27 + $0x2ac] sm:$0xf0] }
  0x5b   : > { %1089 = vmatmul.bf16.gmra.mxu0 %v1806_v9  ;;  %1209 = vmatmul.bf16.gmra.mxu3 %v2094_v10  ;;  %v1870_v9 = vor.u32 %v2293_v4, %v1867_v5 }
  0x5c   : > { %2406 = vmatpush.bf16.msra.mxu3 %v2535_v22  ;;  %1258 = vmatmul.bf16.gmra.mxu1 %v1810_v11  ;;  %v2106_v22 = vor.u32 %v2354_v17, %v2105_v16 }
  0x60   : > { %2407 = vmatpush.bf16.msra.mxu3 %v2552_v25  ;;  %v2286_v25 = vld [vmem:[%s2540_s27 + $0x88] sm:$0xf0] }
  0x61   : > { %v1838_v30 = vor.u32 %v2286_v25, %v1837_v24  ;;  %v2297_v25 = vld [vmem:[%s2540_s27 + $0xe0] sm:$0xf0] }
  0x69   : > { %2239 = vmatmul.msk.bf16.gmra.mxu2 %vm962_vm2, %v1826_v18 }
  0x6b   : > { %1094 = vmatmul.bf16.gmra.mxu0 %v1818_v21  ;;  %1214 = vmatmul.bf16.gmra.mxu3 %v2106_v22  ;;  %v2298_v21 = vld [vmem:[%s2540_s27 + $0xe8] sm:$0xf0] }
  0x6c   : > { %1263 = vmatmul.bf16.gmra.mxu1 %v1822_v23  ;;  %v1877_v23 = vld [vmem:[%s2540_s27 + $0xd8] sm:$0xf]  ;;  %v1886_v29 = vor.u32 %v2298_v21, %v1885_v20  ;;  %v2350_v20 = vld [vmem:[%s2540_s27 + $0x28c] sm:$0xf] }
  0x6d   : > { %v2095_v21 = vld [vmem:[%s2540_s27 + $0x294] sm:$0xf0] }
  0x79   : > { %2240 = vmatmul.msk.bf16.gmra.mxu2 %vm962_vm2, %v1838_v30  ;;  %v2296_v30 = vld [vmem:[%s2540_s27 + $0xdc] sm:$0xf] }
  0x7a   : > { %v1882_v37 = vor.u32 %v2296_v30, %v1879_v31 }
  0x7b   : > { %1099 = vmatmul.bf16.gmra.mxu0 %v1830_v33  ;;  %1219 = vmatmul.bf16.gmra.mxu3 %v2118_v34  ;;  %v1878_v34 = vor.u32 %v2297_v25, %v1877_v23  ;;  %v1903_v25 = vld [vmem:[%s2540_s27 + $0x114] sm:$0xf0] }
  0x7c   : > { %1268 = vmatmul.bf16.gmra.mxu1 %v1834_v35  ;;  %v2074_v35 = vor.u32 %v2344_v26, %v2071_v27 }
  0x89   : > { %2241 = vmatmul.msk.bf16.gmra.mxu2 %vm962_vm2, %v1850_v42 }
  0x8b   : > { %1104 = vmatmul.bf16.gmra.mxu0 %v1842_v45  ;;  %1224 = vmatmul.bf16.gmra.mxu3 %v2130_v46 }
  0x8c   : > { %1273 = vmatmul.bf16.gmra.mxu1 %v1846_v47 }
  0x99   : > { %2242 = vmatmul.msk.bf16.gmra.mxu2 %vm962_vm2, %v1862_v54  ;;  %v2347_v54 = vld [vmem:[%s2540_s27 + $0x274] sm:$0xf] }
  0x9a   : > { %v2086_v63 = vor.u32 %v2347_v54, %v2083_v55  ;;  %v2305_v54 = vld [vmem:[%s2540_s27 + $0x124] sm:$0xf]  ;;  %v1915_v55 = vld [vmem:[%s2540_s27 + $0x12c] sm:$0xf0] }
  0x9b   : > { %1109 = vmatmul.bf16.gmra.mxu0 %v1854_v57  ;;  %1229 = vmatmul.bf16.gmra.mxu3 %v2142_v58  ;;  %v1898_v57 = vor.u32 %v2301_v49, %v1897_v48  ;;  %v2299_v58 = vld [vmem:[%s2540_s27 + $0xf4] sm:$0xf]  ;;  %v2306_v49 = vld [vmem:[%s2540_s27 + $0x128] sm:$0xf0] }
  0x9c   : > { %1278 = vmatmul.bf16.gmra.mxu1 %v1858_v59  ;;  %v1891_v59 = vld [vmem:[%s2540_s27 + $0xfc] sm:$0xf0] }
  0x9d   : > { %v1894_v1 = vor.u32 %v2299_v58, %v1891_v59 }
  0xa8   : > { %v1075_v8 = vpop.f32.mrf.mxu0 }
  0xa9   : > { %2243 = vmatmul.msk.bf16.gmra.mxu2 %vm962_vm2, %v1874_v2  ;;  %v1076_v10 = vadd.f32 %v2652_v3, %v1075_v8  ;;  %v1244_v11 = vpop.f32.mrf.mxu1 }
  0xab   : > { %v1245_v12 = vadd.f32 %v1244_v11, %v1076_v10  ;;  %1114 = vmatmul.bf16.gmra.mxu0 %v1866_v6  ;;  %1363 = vmatmul.bf16.vlgmr.msrb.gmra.mxu3 %v2062_v7 }
  0xac   : > { %v1413_v13 = vpop.f32.mrf.mxu2  ;;  %1283 = vmatmul.bf16.gmra.mxu1 %v1870_v9 }
  0xad   : > { %v1414_v14 = vadd.f32 %v1413_v13, %v1245_v12  ;;  %v1909_v13 = vld [vmem:[%s2540_s27 + $0x110] sm:$0xf] }
  0xae   : > { %v2664_v15 = vpop.f32.mrf.mxu3 }
  0xaf   : > { %v1573_v16 = vpack.c.bf16 %v1414_v14, %v1414_v14  ;;  %v2304_v14 = vld [vmem:[%s2540_s27 + $0x118] sm:$0xf0] }
  0xb0   : > { %v1077_v17 = vpop.f32.mrf.mxu0  ;;  %v1910_v23 = vor.u32 %v2304_v14, %v1909_v13  ;;  %v1925_v14 = vld [vmem:[%s2540_s27 + $0x138] sm:$0xf] }
  0xb1   : > { %1638 = vst.msk [vmem:[%s2662_s17] sm:$0xf] %vm1637_vm3, %v1573_v16  ;;  %v1078_v18 = vadd.f32 %v2652_v3, %v1077_v17  ;;  %v1246_v19 = vpop.f32.mrf.mxu1  ;;  %v1901_v17 = vld [vmem:[%s2540_s27 + $0x108] sm:$0xf] }
  0xb3   : > { %v1247_v22 = vadd.f32 %v1246_v19, %v1078_v18  ;;  %v2303_v19 = vld [vmem:[%s2540_s27 + $0x110] sm:$0xf0] }
  0xb4   : > { %v1415_v24 = vpop.f32.mrf.mxu2 }
  0xb5   : > { %v1416_v28 = vadd.f32 %v1415_v24, %v1247_v22  ;;  %v2302_v24 = vld [vmem:[%s2540_s27 + $0x10c] sm:$0xf] }
  0xb6   : > { %v2677_v32 = vpop.f32.mrf.mxu3  ;;  %v1906_v31 = vor.u32 %v2302_v24, %v1903_v25 }
  0xb7   : > { %v1574_v33 = vpack.c.bf16 %v1416_v28, %v1416_v28  ;;  %v1902_v28 = vor.u32 %v2303_v19, %v1901_v17  ;;  %v2309_v17 = vld [vmem:[%s2540_s27 + $0x140] sm:$0xf0]  ;;  %v2119_v19 = vld [vmem:[%s2540_s27 + $0x2c4] sm:$0xf0] }
  0xb8   : > { %v1080_v36 = vpop.f32.mrf.mxu0 }
  0xb9   : > { %1639 = vst.msk [vmem:[%s2662_s17 + $0x4] sm:$0xf] %vm1637_vm3, %v1574_v33  ;;  %2244 = vmatmul.msk.bf16.gmra.mxu2 %vm962_vm2, %v1886_v29  ;;  %v1081_v38 = vadd.f32 %v2652_v3, %v1080_v36  ;;  %v1249_v39 = vpop.f32.mrf.mxu1  ;;  %v2098_v29 = vor.u32 %v2350_v20, %v2095_v21 }
  0xbb   : > { %v1250_v40 = vadd.f32 %v1249_v39, %v1081_v38  ;;  %1119 = vmatmul.bf16.gmra.mxu0 %v1878_v34  ;;  %1368 = vmatmul.bf16.gmra.mxu3 %v2074_v35 }
  0xbc   : > { %v1418_v41 = vpop.f32.mrf.mxu2  ;;  %1288 = vmatmul.bf16.gmra.mxu1 %v1882_v37 }
  0xbd   : > { %v1419_v42 = vadd.f32 %v1418_v41, %v1250_v40 }
  0xbe   : > { %v2683_v43 = vpop.f32.mrf.mxu3 }
  0xbf   : > { %v1575_v44 = vpack.c.bf16 %v1419_v42, %v1419_v42 }
  0xc0   : > { %v1082_v45 = vpop.f32.mrf.mxu0 }
  0xc1   : > { %1640 = vst.msk [vmem:[%s2662_s17 + $0x8] sm:$0xf] %vm1637_vm3, %v1575_v44  ;;  %v1083_v46 = vadd.f32 %v2652_v3, %v1082_v45  ;;  %v1251_v47 = vpop.f32.mrf.mxu1  ;;  %v1921_v44 = vld [vmem:[%s2540_s27 + $0x128] sm:$0xf]  ;;  %v2307_v45 = vld [vmem:[%s2540_s27 + $0x130] sm:$0xf0] }
  0xc2   : > { %v1922_v53 = vor.u32 %v2307_v45, %v1921_v44  ;;  %v1945_v44 = vld [vmem:[%s2540_s27 + $0x158] sm:$0xf]  ;;  %v2313_v45 = vld [vmem:[%s2540_s27 + $0x160] sm:$0xf0] }
  0xc3   : > { %v1252_v50 = vadd.f32 %v1251_v47, %v1083_v46  ;;  %v1913_v47 = vld [vmem:[%s2540_s27 + $0x120] sm:$0xf] }
  0xc4   : > { %v1420_v52 = vpop.f32.mrf.mxu2  ;;  %v1914_v58 = vor.u32 %v2306_v49, %v1913_v47  ;;  %v1937_v47 = vld [vmem:[%s2540_s27 + $0x150] sm:$0xf]  ;;  %v2312_v49 = vld [vmem:[%s2540_s27 + $0x158] sm:$0xf0] }
  0xc5   : > { %v1421_v56 = vadd.f32 %v1420_v52, %v1252_v50  ;;  %v2353_v50 = vld [vmem:[%s2540_s27 + $0x2a4] sm:$0xf] }
  0xc6   : > { %v2696_v60 = vpop.f32.mrf.mxu3  ;;  %v2110_v59 = vor.u32 %v2353_v50, %v2107_v51  ;;  %v2359_v50 = vld [vmem:[%s2540_s27 + $0x2d4] sm:$0xf]  ;;  %v2131_v51 = vld [vmem:[%s2540_s27 + $0x2dc] sm:$0xf0] }
  0xc7   : > { %v1576_v61 = vpack.c.bf16 %v1421_v56, %v1421_v56 }
  0xc8   : > { %v1085_v0 = vpop.f32.mrf.mxu0 }
  0xc9   : > { %1641 = vst.msk [vmem:[%s2662_s17 + $0xc] sm:$0xf] %vm1637_vm3, %v1576_v61  ;;  %2245 = vmatmul.msk.bf16.gmra.mxu2 %vm962_vm2, %v1898_v57  ;;  %v1086_v2 = vadd.f32 %v2652_v3, %v1085_v0  ;;  %v1254_v4 = vpop.f32.mrf.mxu1 }
  0xcb   : > { %v1255_v5 = vadd.f32 %v1254_v4, %v1086_v2  ;;  %1124 = vmatmul.bf16.gmra.mxu0 %v1890_v62  ;;  %1373 = vmatmul.bf16.gmra.mxu3 %v2086_v63  ;;  %v1918_v62 = vor.u32 %v2305_v54, %v1915_v55  ;;  %v2311_v54 = vld [vmem:[%s2540_s27 + $0x154] sm:$0xf]  ;;  %v1939_v55 = vld [vmem:[%s2540_s27 + $0x15c] sm:$0xf0] }
  0xcc   : > { %v1423_v6 = vpop.f32.mrf.mxu2  ;;  %1293 = vmatmul.bf16.gmra.mxu1 %v1894_v1 }
  0xcd   : > { %v1424_v7 = vadd.f32 %v1423_v6, %v1255_v5 }
  0xce   : > { %v2702_v8 = vpop.f32.mrf.mxu3 }
  0xcf   : > { %v1577_v9 = vpack.c.bf16 %v1424_v7, %v1424_v7 }
  0xd0   : > { %v1087_v10 = vpop.f32.mrf.mxu0 }
  0xd1   : > { %1642 = vst.msk [vmem:[%s2662_s17 + $0x10] sm:$0xf] %vm1637_vm3, %v1577_v9  ;;  %v1088_v11 = vadd.f32 %v2652_v3, %v1087_v10  ;;  %v1256_v12 = vpop.f32.mrf.mxu1 }
  0xd3   : > { %v1257_v16 = vadd.f32 %v1256_v12, %v1088_v11  ;;  %v1933_v11 = vld [vmem:[%s2540_s27 + $0x140] sm:$0xf]  ;;  %v2310_v12 = vld [vmem:[%s2540_s27 + $0x148] sm:$0xf0] }
  0xd4   : > { %v1425_v18 = vpop.f32.mrf.mxu2  ;;  %v1934_v21 = vor.u32 %v2310_v12, %v1933_v11 }
  0xd5   : > { %v1426_v22 = vadd.f32 %v1425_v18, %v1257_v16  ;;  %v2356_v18 = vld [vmem:[%s2540_s27 + $0x2bc] sm:$0xf] }
  0xd6   : > { %v2715_v26 = vpop.f32.mrf.mxu3 }
  0xd7   : > { %v1578_v27 = vpack.c.bf16 %v1426_v22, %v1426_v22  ;;  %v2308_v22 = vld [vmem:[%s2540_s27 + $0x13c] sm:$0xf] }
  0xd8   : > { %v1090_v30 = vpop.f32.mrf.mxu0 }
  0xd9   : > { %1643 = vst.msk [vmem:[%s2662_s17 + $0x14] sm:$0xf] %vm1637_vm3, %v1578_v27  ;;  %2246 = vmatmul.msk.bf16.gmra.mxu2 %vm962_vm2, %v1910_v23  ;;  %v1091_v33 = vadd.f32 %v2652_v3, %v1090_v30  ;;  %v1259_v34 = vpop.f32.mrf.mxu1  ;;  %v1927_v23 = vld [vmem:[%s2540_s27 + $0x144] sm:$0xf0]  ;;  %v1926_v27 = vor.u32 %v2309_v17, %v1925_v14  ;;  %v2316_v14 = vld [vmem:[%s2540_s27 + $0x178] sm:$0xf0] }
  0xda   : > { %v1930_v30 = vor.u32 %v2308_v22, %v1927_v23  ;;  %v1949_v17 = vld [vmem:[%s2540_s27 + $0x168] sm:$0xf] }
  0xdb   : > { %v1260_v35 = vadd.f32 %v1259_v34, %v1091_v33  ;;  %1129 = vmatmul.bf16.gmra.mxu0 %v1902_v28  ;;  %1378 = vmatmul.bf16.gmra.mxu3 %v2098_v29  ;;  %v2122_v28 = vor.u32 %v2356_v18, %v2119_v19  ;;  %v2315_v19 = vld [vmem:[%s2540_s27 + $0x170] sm:$0xf0] }
  0xdc   : > { %v1428_v36 = vpop.f32.mrf.mxu2  ;;  %1298 = vmatmul.bf16.gmra.mxu1 %v1906_v31 }
  0xdd   : > { %v1429_v37 = vadd.f32 %v1428_v36, %v1260_v35 }
  0xde   : > { %v2721_v38 = vpop.f32.mrf.mxu3 }
  0xdf   : > { %v1579_v39 = vpack.c.bf16 %v1429_v37, %v1429_v37 }
  0xe0   : > { %v1092_v40 = vpop.f32.mrf.mxu0 }
  0xe1   : > { %1644 = vst.msk [vmem:[%s2662_s17 + $0x18] sm:$0xf] %vm1637_vm3, %v1579_v39  ;;  %v1093_v41 = vadd.f32 %v2652_v3, %v1092_v40  ;;  %v1261_v42 = vpop.f32.mrf.mxu1 }
  0xe3   : > { %v1262_v46 = vadd.f32 %v1261_v42, %v1093_v41 }
  0xe4   : > { %v1430_v48 = vpop.f32.mrf.mxu2 }
  0xe5   : > { %v1431_v52 = vadd.f32 %v1430_v48, %v1262_v46 }
  0xe6   : > { %v2734_v56 = vpop.f32.mrf.mxu3 }
  0xe7   : > { %v1580_v57 = vpack.c.bf16 %v1431_v52, %v1431_v52 }
  0xe8   : > { %v1095_v61 = vpop.f32.mrf.mxu0 }
  0xe9   : > { %1645 = vst.msk [vmem:[%s2662_s17 + $0x1c] sm:$0xf] %vm1637_vm3, %v1580_v57  ;;  %2247 = vmatmul.msk.bf16.gmra.mxu2 %vm962_vm2, %v1922_v53  ;;  %v1096_v63 = vadd.f32 %v2652_v3, %v1095_v61  ;;  %v1264_v0 = vpop.f32.mrf.mxu1  ;;  %v1946_v53 = vor.u32 %v2313_v45, %v1945_v44  ;;  %v2134_v61 = vor.u32 %v2359_v50, %v2131_v51  ;;  %v1961_v51 = vld [vmem:[%s2540_s27 + $0x180] sm:$0xf] }
  0xeb   : > { %v1265_v1 = vadd.f32 %v1264_v0, %v1096_v63  ;;  %1134 = vmatmul.bf16.gmra.mxu0 %v1914_v58  ;;  %1383 = vmatmul.bf16.gmra.mxu3 %v2110_v59  ;;  %v1938_v59 = vor.u32 %v2312_v49, %v1937_v47  ;;  %v1942_v63 = vor.u32 %v2311_v54, %v1939_v55  ;;  %v2319_v49 = vld [vmem:[%s2540_s27 + $0x190] sm:$0xf0]  ;;  %v2077_v54 = vld [vmem:[%s2540_s27 + $0x260] sm:$0xf]  ;;  %v2346_v55 = vld [vmem:[%s2540_s27 + $0x268] sm:$0xf0] }
  0xec   : > { %v1433_v2 = vpop.f32.mrf.mxu2  ;;  %1303 = vmatmul.bf16.gmra.mxu1 %v1918_v62 }
  0xed   : > { %v1434_v4 = vadd.f32 %v1433_v2, %v1265_v1 }
  0xee   : > { %v2740_v5 = vpop.f32.mrf.mxu3 }
  0xef   : > { %v1581_v6 = vpack.c.bf16 %v1434_v4, %v1434_v4 }
  0xf0   : > { %v1097_v7 = vpop.f32.mrf.mxu0 }
  0xf1   : > { %1646 = vst.msk [vmem:[%s2662_s17 + $0x20] sm:$0xf] %vm1637_vm3, %v1581_v6  ;;  %v1098_v9 = vadd.f32 %v2652_v3, %v1097_v7  ;;  %v1266_v10 = vpop.f32.mrf.mxu1 }
  0xf3   : > { %v1267_v13 = vadd.f32 %v1266_v10, %v1098_v9 }
  0xf4   : > { %v1435_v16 = vpop.f32.mrf.mxu2 }
  0xf5   : > { %v1436_v20 = vadd.f32 %v1435_v16, %v1267_v13  ;;  %v1957_v13 = vld [vmem:[%s2540_s27 + $0x170] sm:$0xf] }
  0xf6   : > { %v2753_v24 = vpop.f32.mrf.mxu3  ;;  %v1958_v23 = vor.u32 %v2316_v14, %v1957_v13  ;;  %v1196_v13 = vadd.f32 %v2652_v3, %v2664_v15  ;;  %v2321_v15 = vld [vmem:[%s2540_s27 + $0x1a0] sm:$0xf0] }
  0xf7   : > { %v1582_v25 = vpack.c.bf16 %v1436_v20, %v1436_v20  ;;  %v2362_v20 = vld [vmem:[%s2540_s27 + $0x2ec] sm:$0xf] }
  0xf8   : > { %v1100_v29 = vpop.f32.mrf.mxu0 }
  0xf9   : > { %1647 = vst.msk [vmem:[%s2662_s17 + $0x24] sm:$0xf] %vm1637_vm3, %v1582_v25  ;;  %2248 = vmatmul.msk.bf16.gmra.mxu2 %vm962_vm2, %v1934_v21  ;;  %v1101_v31 = vadd.f32 %v2652_v3, %v1100_v29  ;;  %v1269_v33 = vpop.f32.mrf.mxu1  ;;  %v2143_v21 = vld [vmem:[%s2540_s27 + $0x2f4] sm:$0xf0]  ;;  %v2314_v25 = vld [vmem:[%s2540_s27 + $0x16c] sm:$0xf] }
  0xfb   : > { %v1270_v34 = vadd.f32 %v1269_v33, %v1101_v31  ;;  %1139 = vmatmul.bf16.gmra.mxu0 %v1926_v27  ;;  %1388 = vmatmul.bf16.gmra.mxu3 %v2122_v28  ;;  %v1951_v27 = vld [vmem:[%s2540_s27 + $0x174] sm:$0xf0]  ;;  %v2146_v31 = vor.u32 %v2362_v20, %v2143_v21 }
  0xfc   : > { %v1438_v35 = vpop.f32.mrf.mxu2  ;;  %1308 = vmatmul.bf16.gmra.mxu1 %v1930_v30  ;;  %v1950_v30 = vor.u32 %v2315_v19, %v1949_v17 }
  0xfd   : > { %v1439_v36 = vadd.f32 %v1438_v35, %v1270_v34  ;;  %v1954_v34 = vor.u32 %v2314_v25, %v1951_v27  ;;  %v1973_v27 = vld [vmem:[%s2540_s27 + $0x198] sm:$0xf] }
  0xfe   : > { %v2759_v37 = vpop.f32.mrf.mxu3 }
  0xff   : > { %v1583_v39 = vpack.c.bf16 %v1439_v36, %v1439_v36 }
 0x100   : > { %v1102_v40 = vpop.f32.mrf.mxu0 }
 0x101   : > { %1648 = vst.msk [vmem:[%s2662_s17 + $0x28] sm:$0xf] %vm1637_vm3, %v1583_v39  ;;  %v1103_v41 = vadd.f32 %v2652_v3, %v1102_v40  ;;  %v1271_v42 = vpop.f32.mrf.mxu1 }
 0x103   : > { %v1272_v46 = vadd.f32 %v1271_v42, %v1103_v41 }
 0x104   : > { %v1440_v48 = vpop.f32.mrf.mxu2 }
 0x105   : > { %v1441_v52 = vadd.f32 %v1440_v48, %v1272_v46  ;;  %v1969_v48 = vld [vmem:[%s2540_s27 + $0x188] sm:$0xf] }
 0x106   : > { %v2772_v57 = vpop.f32.mrf.mxu3 }
 0x107   : > { %v1584_v58 = vpack.c.bf16 %v1441_v52, %v1441_v52 }
 0x108   : > { %v1105_v62 = vpop.f32.mrf.mxu0 }
 0x109   : > { %1649 = vst.msk [vmem:[%s2662_s17 + $0x2c] sm:$0xf] %vm1637_vm3, %v1584_v58  ;;  %2249 = vmatmul.msk.bf16.gmra.mxu2 %vm962_vm2, %v1946_v53  ;;  %v1106_v0 = vadd.f32 %v2652_v3, %v1105_v62  ;;  %v1274_v1 = vpop.f32.mrf.mxu1  ;;  %v2318_v53 = vld [vmem:[%s2540_s27 + $0x188] sm:$0xf0]  ;;  %v1963_v62 = vld [vmem:[%s2540_s27 + $0x18c] sm:$0xf0] }
 0x10b   : > { %v1275_v2 = vadd.f32 %v1274_v1, %v1106_v0  ;;  %1144 = vmatmul.bf16.gmra.mxu0 %v1938_v59  ;;  %1393 = vmatmul.bf16.gmra.mxu3 %v2134_v61  ;;  %v1970_v59 = vor.u32 %v2319_v49, %v1969_v48  ;;  %v2317_v61 = vld [vmem:[%s2540_s27 + $0x184] sm:$0xf]  ;;  %v1962_v1 = vor.u32 %v2318_v53, %v1961_v51 }
 0x10c   : > { %v1443_v4 = vpop.f32.mrf.mxu2  ;;  %1313 = vmatmul.bf16.gmra.mxu1 %v1942_v63 }
 0x10d   : > { %v1444_v6 = vadd.f32 %v1443_v4, %v1275_v2  ;;  %v2078_v2 = vor.u32 %v2346_v55, %v2077_v54 }
 0x10e   : > { %v2778_v7 = vpop.f32.mrf.mxu3 }
 0x10f   : > { %v1585_v9 = vpack.c.bf16 %v1444_v6, %v1444_v6  ;;  %v1966_v6 = vor.u32 %v2317_v61, %v1963_v62 }
 0x110   : > { %v1107_v10 = vpop.f32.mrf.mxu0 }
 0x111   : > { %1650 = vst.msk [vmem:[%s2662_s17 + $0x30] sm:$0xf] %vm1637_vm3, %v1585_v9  ;;  %v1108_v11 = vadd.f32 %v2652_v3, %v1107_v10  ;;  %v1276_v12 = vpop.f32.mrf.mxu1 }
 0x113   : > { %v1277_v16 = vadd.f32 %v1276_v12, %v1108_v11 }
 0x114   : > { %v1445_v18 = vpop.f32.mrf.mxu2 }
 0x115   : > { %v1446_v22 = vadd.f32 %v1445_v18, %v1277_v16 }
 0x116   : > { %v2791_v28 = vpop.f32.mrf.mxu3 }
 0x117   : > { %v1586_v29 = vpack.c.bf16 %v1446_v22, %v1446_v22  ;;  %v1981_v22 = vld [vmem:[%s2540_s27 + $0x1a0] sm:$0xf] }
 0x118   : > { %v1110_v33 = vpop.f32.mrf.mxu0 }
 0x119   : > { %1651 = vst.msk [vmem:[%s2662_s17 + $0x34] sm:$0xf] %vm1637_vm3, %v1586_v29  ;;  %2250 = vmatmul.msk.bf16.gmra.mxu2 %vm962_vm2, %v1958_v23  ;;  %v1111_v35 = vadd.f32 %v2652_v3, %v1110_v33  ;;  %v1279_v36 = vpop.f32.mrf.mxu1  ;;  %v2322_v23 = vld [vmem:[%s2540_s27 + $0x1a8] sm:$0xf0]  ;;  %v1198_v33 = vadd.f32 %v2652_v3, %v2677_v32 }
 0x11b   : > { %v1280_v39 = vadd.f32 %v1279_v36, %v1111_v35  ;;  %1149 = vmatmul.bf16.gmra.mxu0 %v1950_v30  ;;  %1398 = vmatmul.bf16.gmra.mxu3 %v2146_v31  ;;  %v2089_v30 = vld [vmem:[%s2540_s27 + $0x278] sm:$0xf]  ;;  %v2349_v31 = vld [vmem:[%s2540_s27 + $0x280] sm:$0xf0]  ;;  %v1982_v35 = vor.u32 %v2322_v23, %v1981_v22  ;;  %v2320_v36 = vld [vmem:[%s2540_s27 + $0x19c] sm:$0xf] }
 0x11c   : > { %v1448_v40 = vpop.f32.mrf.mxu2  ;;  %1318 = vmatmul.bf16.gmra.mxu1 %v1954_v34 }
 0x11d   : > { %v1449_v41 = vadd.f32 %v1448_v40, %v1280_v39  ;;  %v1975_v39 = vld [vmem:[%s2540_s27 + $0x1a4] sm:$0xf0] }
 0x11e   : > { %v2797_v42 = vpop.f32.mrf.mxu3  ;;  %v1978_v48 = vor.u32 %v2320_v36, %v1975_v39 }
 0x11f   : > { %v1587_v44 = vpack.c.bf16 %v1449_v41, %v1449_v41 }
 0x120   : > { %v1112_v45 = vpop.f32.mrf.mxu0 }
 0x121   : > { %1652 = vst.msk [vmem:[%s2662_s17 + $0x38] sm:$0xf] %vm1637_vm3, %v1587_v44  ;;  %v1113_v46 = vadd.f32 %v2652_v3, %v1112_v45  ;;  %v1281_v47 = vpop.f32.mrf.mxu1  ;;  %v1974_v45 = vor.u32 %v2321_v15, %v1973_v27 }
 0x123   : > { %v1282_v50 = vadd.f32 %v1281_v47, %v1113_v46  ;;  %v2090_v46 = vor.u32 %v2349_v31, %v2089_v30  ;;  %v1206_v30 = vadd.f32 %v2652_v3, %v2702_v8  ;;  %v2327_v8 = vld [vmem:[%s2540_s27 + $0x1d0] sm:$0xf0] }
 0x124   : > { %v1450_v52 = vpop.f32.mrf.mxu2 }
 0x125   : > { %v1451_v58 = vadd.f32 %v1450_v52, %v1282_v50  ;;  %v1201_v52 = vadd.f32 %v2652_v3, %v2683_v43  ;;  %v2324_v43 = vld [vmem:[%s2540_s27 + $0x1b8] sm:$0xf0] }
 0x126   : > { %v2810_v63 = vpop.f32.mrf.mxu3 }
 0x127   : > { %v1588_v0 = vpack.c.bf16 %v1451_v58, %v1451_v58 }
 0x128   : > { %v1115_v4 = vpop.f32.mrf.mxu0 }
 0x129   : > { %1653 = vst.msk [vmem:[%s2662_s17 + $0x3c] sm:$0xf] %vm1637_vm3, %v1588_v0  ;;  %2251 = vmatmul.msk.bf16.gmra.mxu2 %vm962_vm2, %v1970_v59  ;;  %v1116_v9 = vadd.f32 %v2652_v3, %v1115_v4  ;;  %v1284_v10 = vpop.f32.mrf.mxu1  ;;  %v1993_v0 = vld [vmem:[%s2540_s27 + $0x1b8] sm:$0xf]  ;;  %v1985_v4 = vld [vmem:[%s2540_s27 + $0x1b0] sm:$0xf] }
 0x12b   : > { %v1285_v11 = vadd.f32 %v1284_v10, %v1116_v9  ;;  %1154 = vmatmul.bf16.gmra.mxu0 %v1962_v1  ;;  %2260 = vmatmul.msk.bf16.vlgmr.msra.gmra.mxu3 %vm962_vm2, %v2078_v2  ;;  %v2325_v1 = vld [vmem:[%s2540_s27 + $0x1c0] sm:$0xf0]  ;;  %v2101_v9 = vld [vmem:[%s2540_s27 + $0x290] sm:$0xf]  ;;  %v2352_v10 = vld [vmem:[%s2540_s27 + $0x298] sm:$0xf0] }
 0x12c   : > { %v1453_v12 = vpop.f32.mrf.mxu2  ;;  %1323 = vmatmul.bf16.gmra.mxu1 %v1966_v6  ;;  %v2102_v22 = vor.u32 %v2352_v10, %v2101_v9  ;;  %v1211_v9 = vadd.f32 %v2652_v3, %v2721_v38  ;;  %v2330_v38 = vld [vmem:[%s2540_s27 + $0x1e8] sm:$0xf0] }
 0x12d   : > { %v1454_v14 = vadd.f32 %v1453_v12, %v1285_v11  ;;  %v1203_v11 = vadd.f32 %v2652_v3, %v2696_v60 }
 0x12e   : > { %v1364_v16 = vpop.f32.mrf.mxu3 }
 0x12f   : > { %v1589_v17 = vpack.c.bf16 %v1454_v14, %v1454_v14  ;;  %v2819_v18 = vadd.f32 %v1364_v16, %v1196_v13  ;;  %v1994_v13 = vor.u32 %v2325_v1, %v1993_v0  ;;  %v2323_v14 = vld [vmem:[%s2540_s27 + $0x1b4] sm:$0xf]  ;;  %v1987_v16 = vld [vmem:[%s2540_s27 + $0x1bc] sm:$0xf0] }
 0x130   : > { %v1117_v19 = vpop.f32.mrf.mxu0 }
 0x131   : > { %1654 = vst.msk [vmem:[%s2662_s17 + $0x40] sm:$0xf] %vm1637_vm3, %v1589_v17  ;;  %v1118_v20 = vadd.f32 %v2652_v3, %v1117_v19  ;;  %v1286_v21 = vpop.f32.mrf.mxu1 }
 0x133   : > { %v1287_v25 = vadd.f32 %v1286_v21, %v1118_v20  ;;  %v1986_v21 = vor.u32 %v2324_v43, %v1985_v4 }
 0x134   : > { %v1455_v29 = vpop.f32.mrf.mxu2 }
 0x135   : > { %v1456_v34 = vadd.f32 %v1455_v29, %v1287_v25  ;;  %v1990_v25 = vor.u32 %v2323_v14, %v1987_v16 }
 0x136   : > { %v1366_v40 = vpop.f32.mrf.mxu3 }
 0x137   : > { %v1590_v41 = vpack.c.bf16 %v1456_v34, %v1456_v34  ;;  %v2834_v44 = vadd.f32 %v1366_v40, %v1198_v33 }
 0x138   : > { %v1120_v47 = vpop.f32.mrf.mxu0 }
 0x139   : > { %1655 = vst.msk [vmem:[%s2662_s17 + $0x44] sm:$0xf] %vm1637_vm3, %v1590_v41  ;;  %2252 = vmatmul.msk.bf16.gmra.mxu2 %vm962_vm2, %v1982_v35  ;;  %v1121_v49 = vadd.f32 %v2652_v3, %v1120_v47  ;;  %v1289_v32 = vpop.f32.mrf.mxu1  ;;  %v2005_v41 = vld [vmem:[%s2540_s27 + $0x1d0] sm:$0xf]  ;;  %v1997_v47 = vld [vmem:[%s2540_s27 + $0x1c8] sm:$0xf] }
 0x13b   : > { %v1290_v50 = vadd.f32 %v1289_v32, %v1121_v49  ;;  %1159 = vmatmul.bf16.gmra.mxu0 %v1974_v45  ;;  %2261 = vmatmul.msk.bf16.gmra.mxu3 %vm962_vm2, %v2090_v46  ;;  %v2328_v45 = vld [vmem:[%s2540_s27 + $0x1d8] sm:$0xf0]  ;;  %v2113_v49 = vld [vmem:[%s2540_s27 + $0x2a8] sm:$0xf]  ;;  %v2355_v32 = vld [vmem:[%s2540_s27 + $0x2b0] sm:$0xf0] }
 0x13c   : > { %v1458_v51 = vpop.f32.mrf.mxu2  ;;  %1328 = vmatmul.bf16.gmra.mxu1 %v1978_v48  ;;  %v2114_v0 = vor.u32 %v2355_v32, %v2113_v49  ;;  %v1216_v49 = vadd.f32 %v2652_v3, %v2740_v5  ;;  %v2333_v5 = vld [vmem:[%s2540_s27 + $0x200] sm:$0xf0] }
 0x13d   : > { %v1459_v53 = vadd.f32 %v1458_v51, %v1290_v50  ;;  %v1208_v50 = vadd.f32 %v2652_v3, %v2715_v26 }
 0x13e   : > { %v1369_v54 = vpop.f32.mrf.mxu3 }
 0x13f   : > { %v1591_v55 = vpack.c.bf16 %v1459_v53, %v1459_v53  ;;  %v2843_v58 = vadd.f32 %v1369_v54, %v1201_v52  ;;  %v2006_v52 = vor.u32 %v2328_v45, %v2005_v41  ;;  %v2326_v53 = vld [vmem:[%s2540_s27 + $0x1cc] sm:$0xf]  ;;  %v1999_v54 = vld [vmem:[%s2540_s27 + $0x1d4] sm:$0xf0] }
 0x140   : > { %v1122_v59 = vpop.f32.mrf.mxu0 }
 0x141   : > { %1656 = vst.msk [vmem:[%s2662_s17 + $0x48] sm:$0xf] %vm1637_vm3, %v1591_v55  ;;  %v1123_v61 = vadd.f32 %v2652_v3, %v1122_v59  ;;  %v1291_v62 = vpop.f32.mrf.mxu1 }
 0x143   : > { %v1292_v2 = vadd.f32 %v1291_v62, %v1123_v61  ;;  %v1998_v62 = vor.u32 %v2327_v8, %v1997_v47 }
 0x144   : > { %v1460_v6 = vpop.f32.mrf.mxu2 }
 0x145   : > { %v1461_v12 = vadd.f32 %v1460_v6, %v1292_v2  ;;  %v2002_v2 = vor.u32 %v2326_v53, %v1999_v54 }
 0x146   : > { %v1371_v17 = vpop.f32.mrf.mxu3 }
 0x147   : > { %v1592_v19 = vpack.c.bf16 %v1461_v12, %v1461_v12  ;;  %v2858_v20 = vadd.f32 %v1371_v17, %v1203_v11 }
 0x148   : > { %v1125_v23 = vpop.f32.mrf.mxu0 }
 0x149   : > { %1657 = vst.msk [vmem:[%s2662_s17 + $0x4c] sm:$0xf] %vm1637_vm3, %v1592_v19  ;;  %2253 = vmatmul.msk.bf16.gmra.mxu2 %vm962_vm2, %v1994_v13  ;;  %v1126_v27 = vadd.f32 %v2652_v3, %v1125_v23  ;;  %v1294_v60 = vpop.f32.mrf.mxu1  ;;  %v2017_v19 = vld [vmem:[%s2540_s27 + $0x1e8] sm:$0xf]  ;;  %v2009_v23 = vld [vmem:[%s2540_s27 + $0x1e0] sm:$0xf] }
 0x14b   : > { %v1295_v29 = vadd.f32 %v1294_v60, %v1126_v27  ;;  %1164 = vmatmul.bf16.gmra.mxu0 %v1986_v21  ;;  %2262 = vmatmul.msk.bf16.gmra.mxu3 %vm962_vm2, %v2102_v22  ;;  %v2331_v21 = vld [vmem:[%s2540_s27 + $0x1f0] sm:$0xf0]  ;;  %v2125_v27 = vld [vmem:[%s2540_s27 + $0x2c0] sm:$0xf]  ;;  %v2358_v60 = vld [vmem:[%s2540_s27 + $0x2c8] sm:$0xf0] }
 0x14c   : > { %v1463_v15 = vpop.f32.mrf.mxu2  ;;  %1333 = vmatmul.bf16.gmra.mxu1 %v1990_v25  ;;  %v2126_v41 = vor.u32 %v2358_v60, %v2125_v27  ;;  %v1221_v27 = vadd.f32 %v2652_v3, %v2759_v37  ;;  %v2336_v37 = vld [vmem:[%s2540_s27 + $0x218] sm:$0xf0] }
 0x14d   : > { %v1464_v31 = vadd.f32 %v1463_v15, %v1295_v29  ;;  %v1213_v29 = vadd.f32 %v2652_v3, %v2734_v56 }
 0x14e   : > { %v1374_v33 = vpop.f32.mrf.mxu3 }
 0x14f   : > { %v1593_v34 = vpack.c.bf16 %v1464_v31, %v1464_v31  ;;  %v2867_v35 = vadd.f32 %v1374_v33, %v1206_v30  ;;  %v2018_v30 = vor.u32 %v2331_v21, %v2017_v19  ;;  %v2329_v31 = vld [vmem:[%s2540_s27 + $0x1e4] sm:$0xf]  ;;  %v2011_v33 = vld [vmem:[%s2540_s27 + $0x1ec] sm:$0xf0] }
 0x150   : > { %v1127_v36 = vpop.f32.mrf.mxu0 }
 0x151   : > { %1658 = vst.msk [vmem:[%s2662_s17 + $0x50] sm:$0xf] %vm1637_vm3, %v1593_v34  ;;  %v1128_v39 = vadd.f32 %v2652_v3, %v1127_v36  ;;  %v1296_v40 = vpop.f32.mrf.mxu1 }
 0x153   : > { %v1297_v46 = vadd.f32 %v1296_v40, %v1128_v39  ;;  %v2010_v40 = vor.u32 %v2330_v38, %v2009_v23 }
 0x154   : > { %v1465_v48 = vpop.f32.mrf.mxu2 }
 0x155   : > { %v1466_v51 = vadd.f32 %v1465_v48, %v1297_v46  ;;  %v2014_v46 = vor.u32 %v2329_v31, %v2011_v33 }
 0x156   : > { %v1376_v55 = vpop.f32.mrf.mxu3 }
 0x157   : > { %v1594_v59 = vpack.c.bf16 %v1466_v51, %v1466_v51  ;;  %v2882_v61 = vadd.f32 %v1376_v55, %v1208_v50 }
 0x158   : > { %v1130_v1 = vpop.f32.mrf.mxu0 }
 0x159   : > { %1659 = vst.msk [vmem:[%s2662_s17 + $0x54] sm:$0xf] %vm1637_vm3, %v1594_v59  ;;  %2254 = vmatmul.msk.bf16.gmra.mxu2 %vm962_vm2, %v2006_v52  ;;  %v1131_v4 = vadd.f32 %v2652_v3, %v1130_v1  ;;  %v1299_v26 = vpop.f32.mrf.mxu1  ;;  %v2029_v59 = vld [vmem:[%s2540_s27 + $0x200] sm:$0xf]  ;;  %v2021_v1 = vld [vmem:[%s2540_s27 + $0x1f8] sm:$0xf] }
 0x15b   : > { %v1300_v6 = vadd.f32 %v1299_v26, %v1131_v4  ;;  %1169 = vmatmul.bf16.gmra.mxu0 %v1998_v62  ;;  %2263 = vmatmul.msk.bf16.gmra.mxu3 %vm962_vm2, %v2114_v0  ;;  %v2334_v62 = vld [vmem:[%s2540_s27 + $0x208] sm:$0xf0]  ;;  %v2137_v4 = vld [vmem:[%s2540_s27 + $0x2d8] sm:$0xf]  ;;  %v2361_v26 = vld [vmem:[%s2540_s27 + $0x2e0] sm:$0xf0] }
 0x15c   : > { %v1468_v43 = vpop.f32.mrf.mxu2  ;;  %1338 = vmatmul.bf16.gmra.mxu1 %v2002_v2  ;;  %v2138_v19 = vor.u32 %v2361_v26, %v2137_v4  ;;  %v2964_v4 = vld [vmem:[%s3104_s2] ss:$0 sm:$0xff] }
 0x15d   : > { %v1469_v10 = vadd.f32 %v1468_v43, %v1300_v6  ;;  %v1218_v6 = vadd.f32 %v2652_v3, %v2753_v24  ;;  %v1226_v26 = vadd.f32 %v2964_v4, %v2778_v7  ;;  %v2339_v7 = vld [vmem:[%s2540_s27 + $0x230] sm:$0xf0] }
 0x15e   : > { %v1379_v11 = vpop.f32.mrf.mxu3 }
 0x15f   : > { %v1595_v12 = vpack.c.bf16 %v1469_v10, %v1469_v10  ;;  %v2891_v13 = vadd.f32 %v1379_v11, %v1211_v9  ;;  %v2030_v9 = vor.u32 %v2334_v62, %v2029_v59  ;;  %v2332_v10 = vld [vmem:[%s2540_s27 + $0x1fc] sm:$0xf]  ;;  %v2023_v11 = vld [vmem:[%s2540_s27 + $0x204] sm:$0xf0] }
 0x160   : > { %v1132_v14 = vpop.f32.mrf.mxu0 }
 0x161   : > { %1660 = vst.msk [vmem:[%s2662_s17 + $0x58] sm:$0xf] %vm1637_vm3, %v1595_v12  ;;  %v1133_v16 = vadd.f32 %v2652_v3, %v1132_v14  ;;  %v1301_v17 = vpop.f32.mrf.mxu1 }
 0x163   : > { %v1302_v22 = vadd.f32 %v1301_v17, %v1133_v16  ;;  %v2022_v17 = vor.u32 %v2333_v5, %v2021_v1 }
 0x164   : > { %v1470_v25 = vpop.f32.mrf.mxu2 }
 0x165   : > { %v1471_v15 = vadd.f32 %v1470_v25, %v1302_v22  ;;  %v2026_v22 = vor.u32 %v2332_v10, %v2023_v11 }
 0x166   : > { %v1381_v34 = vpop.f32.mrf.mxu3 }
 0x167   : > { %v1596_v36 = vpack.c.bf16 %v1471_v15, %v1471_v15  ;;  %v2906_v39 = vadd.f32 %v1381_v34, %v1213_v29 }
 0x168   : > { %v1135_v45 = vpop.f32.mrf.mxu0 }
 0x169   : > { %1661 = vst.msk [vmem:[%s2662_s17 + $0x5c] sm:$0xf] %vm1637_vm3, %v1596_v36  ;;  %2255 = vmatmul.msk.bf16.gmra.mxu2 %vm962_vm2, %v2018_v30  ;;  %v1136_v47 = vadd.f32 %v2652_v3, %v1135_v45  ;;  %v1304_v56 = vpop.f32.mrf.mxu1  ;;  %v2041_v36 = vld [vmem:[%s2540_s27 + $0x218] sm:$0xf]  ;;  %v2033_v45 = vld [vmem:[%s2540_s27 + $0x210] sm:$0xf] }
 0x16b   : > { %v1305_v48 = vadd.f32 %v1304_v56, %v1136_v47  ;;  %1174 = vmatmul.bf16.gmra.mxu0 %v2010_v40  ;;  %2264 = vmatmul.msk.bf16.gmra.mxu3 %vm962_vm2, %v2126_v41  ;;  %v2337_v40 = vld [vmem:[%s2540_s27 + $0x220] sm:$0xf0]  ;;  %v2149_v47 = vld [vmem:[%s2540_s27 + $0x2f0] sm:$0xf]  ;;  %v2364_v56 = vld [vmem:[%s2540_s27 + $0x2f8] sm:$0xf0] }
 0x16c   : > { %v1473_v8 = vpop.f32.mrf.mxu2  ;;  %1343 = vmatmul.bf16.gmra.mxu1 %v2014_v46  ;;  %v2150_v59 = vor.u32 %v2364_v56, %v2149_v47 }
 0x16d   : > { %v1474_v32 = vadd.f32 %v1473_v8, %v1305_v48  ;;  %v1223_v48 = vadd.f32 %v2652_v3, %v2772_v57 }
 0x16e   : > { %v1384_v50 = vpop.f32.mrf.mxu3 }
 0x16f   : > { %v1597_v51 = vpack.c.bf16 %v1474_v32, %v1474_v32  ;;  %v2915_v52 = vadd.f32 %v1384_v50, %v1216_v49  ;;  %v2042_v49 = vor.u32 %v2337_v40, %v2041_v36  ;;  %v2335_v32 = vld [vmem:[%s2540_s27 + $0x214] sm:$0xf]  ;;  %v2035_v50 = vld [vmem:[%s2540_s27 + $0x21c] sm:$0xf0] }
 0x170   : > { %v1137_v53 = vpop.f32.mrf.mxu0 }
 0x171   : > { %1662 = vst.msk [vmem:[%s2662_s17 + $0x60] sm:$0xf] %vm1637_vm3, %v1597_v51  ;;  %v1138_v54 = vadd.f32 %v2652_v3, %v1137_v53  ;;  %v1306_v55 = vpop.f32.mrf.mxu1 }
 0x173   : > { %v1307_v0 = vadd.f32 %v1306_v55, %v1138_v54  ;;  %v2034_v55 = vor.u32 %v2336_v37, %v2033_v45  ;;  %v1231_v45 = vadd.f32 %v2964_v4, %v2797_v42 }
 0x174   : > { %v1475_v2 = vpop.f32.mrf.mxu2 }
 0x175   : > { %v1476_v43 = vadd.f32 %v1475_v2, %v1307_v0  ;;  %v2038_v0 = vor.u32 %v2335_v32, %v2035_v50  ;;  %v2065_v32 = vld [vmem:[%s2540_s27 + $0x248] sm:$0xf]  ;;  %v2343_v50 = vld [vmem:[%s2540_s27 + $0x250] sm:$0xf0] }
 0x176   : > { %v1386_v12 = vpop.f32.mrf.mxu3 }
 0x177   : > { %v1598_v14 = vpack.c.bf16 %v1476_v43, %v1476_v43  ;;  %v2930_v16 = vadd.f32 %v1386_v12, %v1218_v6 }
 0x178   : > { %v1140_v21 = vpop.f32.mrf.mxu0 }
 0x179   : > { %1663 = vst.msk [vmem:[%s2662_s17 + $0x64] sm:$0xf] %vm1637_vm3, %v1598_v14  ;;  %2256 = vmatmul.msk.bf16.gmra.mxu2 %vm962_vm2, %v2030_v9  ;;  %v1141_v23 = vadd.f32 %v2652_v3, %v1140_v21  ;;  %v1309_v24 = vpop.f32.mrf.mxu1  ;;  %v2053_v14 = vld [vmem:[%s2540_s27 + $0x230] sm:$0xf] }
 0x17b   : > { %v1310_v25 = vadd.f32 %v1309_v24, %v1141_v23  ;;  %1179 = vmatmul.bf16.gmra.mxu0 %v2022_v17  ;;  %2265 = vmatmul.msk.bf16.gmra.mxu3 %vm962_vm2, %v2138_v19  ;;  %v2340_v17 = vld [vmem:[%s2540_s27 + $0x238] sm:$0xf0]  ;;  %v1228_v23 = vadd.f32 %v2964_v4, %v2791_v28 }
 0x17c   : > { %v1478_v38 = vpop.f32.mrf.mxu2  ;;  %1348 = vmatmul.bf16.gmra.mxu1 %v2026_v22  ;;  %v2045_v22 = vld [vmem:[%s2540_s27 + $0x228] sm:$0xf] }
 0x17d   : > { %v1479_v60 = vadd.f32 %v1478_v38, %v1310_v25  ;;  %v2054_v25 = vor.u32 %v2340_v17, %v2053_v14  ;;  %v2338_v38 = vld [vmem:[%s2540_s27 + $0x22c] sm:$0xf] }
 0x17e   : > { %v1389_v29 = vpop.f32.mrf.mxu3 }
 0x17f   : > { %v1599_v15 = vpack.c.bf16 %v1479_v60, %v1479_v60  ;;  %v2939_v30 = vadd.f32 %v1389_v29, %v1221_v27  ;;  %v2047_v27 = vld [vmem:[%s2540_s27 + $0x234] sm:$0xf0] }
 0x180   : > { %v1142_v31 = vpop.f32.mrf.mxu0 }
 0x181   : > { %1664 = vst.msk [vmem:[%s2662_s17 + $0x68] sm:$0xf] %vm1637_vm3, %v1599_v15  ;;  %v1143_v33 = vadd.f32 %v2652_v3, %v1142_v31  ;;  %v1311_v34 = vpop.f32.mrf.mxu1  ;;  %v2046_v31 = vor.u32 %v2339_v7, %v2045_v22 }
 0x183   : > { %v1312_v41 = vadd.f32 %v1311_v34, %v1143_v33  ;;  %v2050_v34 = vor.u32 %v2338_v38, %v2047_v27 }
 0x184   : > { %v1480_v46 = vpop.f32.mrf.mxu2 }
 0x185   : > { %v1481_v8 = vadd.f32 %v1480_v46, %v1312_v41 }
 0x186   : > { %v1391_v51 = vpop.f32.mrf.mxu3 }
 0x187   : > { %v1600_v53 = vpack.c.bf16 %v1481_v8, %v1481_v8  ;;  %v2954_v54 = vadd.f32 %v1391_v51, %v1223_v48 }
 0x188   : > { %v1145_v62 = vpop.f32.mrf.mxu0 }
 0x189   : > { %1665 = vst.msk [vmem:[%s2662_s17 + $0x6c] sm:$0xf] %vm1637_vm3, %v1600_v53  ;;  %2257 = vmatmul.msk.bf16.gmra.mxu2 %vm962_vm2, %v2042_v49  ;;  %v1146_v1 = vadd.f32 %v2652_v3, %v1145_v62  ;;  %v1314_v57 = vpop.f32.mrf.mxu1 }
 0x18b   : > { %v1315_v2 = vadd.f32 %v1314_v57, %v1146_v1  ;;  %1184 = vmatmul.bf16.gmra.mxu0 %v2034_v55  ;;  %2266 = vmatmul.msk.bf16.gmra.mxu3 %vm962_vm2, %v2150_v59  ;;  %v1233_v55 = vadd.f32 %v2964_v4, %v2810_v63  ;;  %v2066_v59 = vor.u32 %v2343_v50, %v2065_v32 }
 0x18c   : > { %v1483_v5 = vpop.f32.mrf.mxu2  ;;  %1353 = vmatmul.bf16.gmra.mxu1 %v2038_v0 }
 0x18d   : > { %v1484_v3 = vadd.f32 %v1483_v5, %v1315_v2 }
 0x18e   : > { %v1394_v6 = vpop.f32.mrf.mxu3 }
 0x18f   : > { %v1601_v43 = vpack.c.bf16 %v1484_v3, %v1484_v3  ;;  %v2968_v9 = vadd.f32 %v1394_v6, %v1226_v26 }
 0x190   : > { %v1147_v10 = vpop.f32.mrf.mxu0 }
 0x191   : > { %1666 = vst.msk [vmem:[%s2662_s17 + $0x70] sm:$0xf] %vm1637_vm3, %v1601_v43  ;;  %v1148_v11 = vadd.f32 %v2964_v4, %v1147_v10  ;;  %v1316_v12 = vpop.f32.mrf.mxu1 }
 0x193   : > { %v1317_v19 = vadd.f32 %v1316_v12, %v1148_v11 }
 0x194   : > { %v1485_v21 = vpop.f32.mrf.mxu2 }
 0x195   : > { %v1486_v24 = vadd.f32 %v1485_v21, %v1317_v19 }
 0x196   : > { %v1396_v60 = vpop.f32.mrf.mxu3 }
 0x197   : > { %v1602_v29 = vpack.c.bf16 %v1486_v24, %v1486_v24  ;;  %v2981_v15 = vadd.f32 %v1396_v60, %v1228_v23 }
 0x198   : > { %v1150_v33 = vpop.f32.mrf.mxu0 }
 0x199   : > { %1667 = vst.msk [vmem:[%s2662_s17 + $0x74] sm:$0xf] %vm1637_vm3, %v1602_v29  ;;  %2258 = vmatmul.msk.bf16.gmra.mxu2 %vm962_vm2, %v2054_v25  ;;  %v1151_v36 = vadd.f32 %v2964_v4, %v1150_v33  ;;  %v1319_v28 = vpop.f32.mrf.mxu1 }
 0x19b   : > { %v1320_v40 = vadd.f32 %v1319_v28, %v1151_v36  ;;  %1189 = vmatmul.bf16.gmra.mxu0 %v2046_v31 }
 0x19c   : > { %v1488_v41 = vpop.f32.mrf.mxu2  ;;  %1358 = vmatmul.bf16.gmra.mxu1 %v2050_v34 }
 0x19d   : > { %v1489_v46 = vadd.f32 %v1488_v41, %v1320_v40 }
 0x19e   : > { %v1399_v37 = vpop.f32.mrf.mxu3 }
 0x19f   : > { %v1603_v47 = vpack.c.bf16 %v1489_v46, %v1489_v46  ;;  %v2989_v56 = vadd.f32 %v1399_v37, %v1231_v45 }
 0x1a0   : > { %v1152_v48 = vpop.f32.mrf.mxu0 }
 0x1a1   : > { %1668 = vst.msk [vmem:[%s2662_s17 + $0x78] sm:$0xf] %vm1637_vm3, %v1603_v47  ;;  %v1153_v8 = vadd.f32 %v2964_v4, %v1152_v48  ;;  %v1321_v49 = vpop.f32.mrf.mxu1 }
 0x1a3   : > { %v1322_v51 = vadd.f32 %v1321_v49, %v1153_v8 }
 0x1a4   : > { %v1490_v53 = vpop.f32.mrf.mxu2 }
 0x1a5   : > { %v1491_v42 = vadd.f32 %v1490_v53, %v1322_v51 }
 0x1a6   : > { %v1401_v62 = vpop.f32.mrf.mxu3 }
 0x1a7   : > { %v1604_v0 = vpack.c.bf16 %v1491_v42, %v1491_v42  ;;  %v2998_v1 = vadd.f32 %v1401_v62, %v1233_v55 }
 0x1a8   : > { %v1155_v57 = vpop.f32.mrf.mxu0 }
 0x1a9   : > { %1669 = vst.msk [vmem:[%s2662_s17 + $0x7c] sm:$0xf] %vm1637_vm3, %v1604_v0  ;;  %2259 = vmatmul.msk.bf16.gmra.mxu2 %vm962_vm2, %v2066_v59  ;;  %v1156_v2 = vadd.f32 %v2964_v4, %v1155_v57  ;;  %v1324_v5 = vpop.f32.mrf.mxu1 }
 0x1ab   : > { %v1325_v26 = vadd.f32 %v1324_v5, %v1156_v2 }
 0x1ac   : > { %v1493_v3 = vpop.f32.mrf.mxu2 }
 0x1ad   : > { %v1494_v6 = vadd.f32 %v1493_v3, %v1325_v26 }
 0x1ae   : > { %v1538_v63 = vpop.f32.mrf.mxu3 }
 0x1af   : > { %v1605_v43 = vpack.c.bf16 %v1494_v6, %v1494_v6  ;;  %v1539_v10 = vadd.f32 %v1538_v63, %v2843_v58 }
 0x1b0   : > { %v1157_v11 = vpop.f32.mrf.mxu0 }
 0x1b1   : > { %1670 = vst.msk [vmem:[%s2662_s17 + $0x80] sm:$0xf] %vm1637_vm3, %v1605_v43  ;;  %v1623_v12 = vpack.c.bf16 %v1539_v10, %v1539_v10  ;;  %v1158_v14 = vadd.f32 %v2964_v4, %v1157_v11  ;;  %v1326_v17 = vpop.f32.mrf.mxu1 }
 0x1b3   : > { %1688 = vst.msk [vmem:[%s2662_s17 + $0xc8] sm:$0xf] %vm1637_vm3, %v1623_v12  ;;  %v1327_v19 = vadd.f32 %v1326_v17, %v1158_v14 }
 0x1b4   : > { %v1495_v21 = vpop.f32.mrf.mxu2 }
 0x1b5   : > { %v1496_v22 = vadd.f32 %v1495_v21, %v1327_v19 }
 0x1b6   : > { %v1540_v7 = vpop.f32.mrf.mxu3 }
 0x1b7   : > { %v1606_v23 = vpack.c.bf16 %v1496_v22, %v1496_v22  ;;  %v1541_v24 = vadd.f32 %v1540_v7, %v2858_v20 }
 0x1b8   : > { %v1160_v25 = vpop.f32.mrf.mxu0 }
 0x1b9   : > { %1671 = vst.msk [vmem:[%s2662_s17 + $0x84] sm:$0xf] %vm1637_vm3, %v1606_v23  ;;  %v1624_v58 = vpack.c.bf16 %v1541_v24, %v1541_v24  ;;  %v1161_v38 = vadd.f32 %v2964_v4, %v1160_v25  ;;  %v1329_v27 = vpop.f32.mrf.mxu1 }
 0x1bb   : > { %1689 = vst.msk [vmem:[%s2662_s17 + $0xcc] sm:$0xf] %vm1637_vm3, %v1624_v58  ;;  %v1330_v60 = vadd.f32 %v1329_v27, %v1161_v38 }
 0x1bc   : > { %v1498_v29 = vpop.f32.mrf.mxu2 }
 0x1bd   : > { %v1499_v31 = vadd.f32 %v1498_v29, %v1330_v60 }
 0x1be   : > { %v1543_v33 = vpop.f32.mrf.mxu3 }
 0x1bf   : > { %v1607_v34 = vpack.c.bf16 %v1499_v31, %v1499_v31  ;;  %v1544_v36 = vadd.f32 %v1543_v33, %v2867_v35 }
 0x1c0   : > { %v1162_v28 = vpop.f32.mrf.mxu0 }
 0x1c1   : > { %1672 = vst.msk [vmem:[%s2662_s17 + $0x88] sm:$0xf] %vm1637_vm3, %v1607_v34  ;;  %v1625_v20 = vpack.c.bf16 %v1544_v36, %v1544_v36  ;;  %v1163_v40 = vadd.f32 %v2964_v4, %v1162_v28  ;;  %v1331_v41 = vpop.f32.mrf.mxu1 }
 0x1c3   : > { %1690 = vst.msk [vmem:[%s2662_s17 + $0xd0] sm:$0xf] %vm1637_vm3, %v1625_v20  ;;  %v1332_v45 = vadd.f32 %v1331_v41, %v1163_v40 }
 0x1c4   : > { %v1500_v46 = vpop.f32.mrf.mxu2 }
 0x1c5   : > { %v1501_v37 = vadd.f32 %v1500_v46, %v1332_v45 }
 0x1c6   : > { %v1545_v47 = vpop.f32.mrf.mxu3 }
 0x1c7   : > { %v1608_v48 = vpack.c.bf16 %v1501_v37, %v1501_v37  ;;  %v1546_v8 = vadd.f32 %v1545_v47, %v2882_v61 }
 0x1c8   : > { %v1165_v49 = vpop.f32.mrf.mxu0 }
 0x1c9   : > { %1673 = vst.msk [vmem:[%s2662_s17 + $0x8c] sm:$0xf] %vm1637_vm3, %v1608_v48  ;;  %v1626_v35 = vpack.c.bf16 %v1546_v8, %v1546_v8  ;;  %v1166_v32 = vadd.f32 %v2964_v4, %v1165_v49  ;;  %v1334_v50 = vpop.f32.mrf.mxu1 }
 0x1cb   : > { %1691 = vst.msk [vmem:[%s2662_s17 + $0xd4] sm:$0xf] %vm1637_vm3, %v1626_v35  ;;  %v1335_v51 = vadd.f32 %v1334_v50, %v1166_v32 }
 0x1cc   : > { %v1503_v53 = vpop.f32.mrf.mxu2 }
 0x1cd   : > { %v1504_v55 = vadd.f32 %v1503_v53, %v1335_v51 }
 0x1ce   : > { %v1548_v42 = vpop.f32.mrf.mxu3 }
 0x1cf   : > { %v1609_v59 = vpack.c.bf16 %v1504_v55, %v1504_v55  ;;  %v1549_v62 = vadd.f32 %v1548_v42, %v2891_v13 }
 0x1d0   : > { %v1167_v0 = vpop.f32.mrf.mxu0 }
 0x1d1   : > { %1674 = vst.msk [vmem:[%s2662_s17 + $0x90] sm:$0xf] %vm1637_vm3, %v1609_v59  ;;  %v1627_v61 = vpack.c.bf16 %v1549_v62, %v1549_v62  ;;  %v1168_v57 = vadd.f32 %v2964_v4, %v1167_v0  ;;  %v1336_v2 = vpop.f32.mrf.mxu1 }
 0x1d3   : > { %1692 = vst.msk [vmem:[%s2662_s17 + $0xd8] sm:$0xf] %vm1637_vm3, %v1627_v61  ;;  %v1337_v5 = vadd.f32 %v1336_v2, %v1168_v57 }
 0x1d4   : > { %v1505_v26 = vpop.f32.mrf.mxu2 }
 0x1d5   : > { %v1506_v3 = vadd.f32 %v1505_v26, %v1337_v5 }
 0x1d6   : > { %v1550_v6 = vpop.f32.mrf.mxu3 }
 0x1d7   : > { %v1610_v63 = vpack.c.bf16 %v1506_v3, %v1506_v3  ;;  %v1551_v43 = vadd.f32 %v1550_v6, %v2906_v39 }
 0x1d8   : > { %v1170_v10 = vpop.f32.mrf.mxu0 }
 0x1d9   : > { %1675 = vst.msk [vmem:[%s2662_s17 + $0x94] sm:$0xf] %vm1637_vm3, %v1610_v63  ;;  %v1628_v13 = vpack.c.bf16 %v1551_v43, %v1551_v43  ;;  %v1171_v11 = vadd.f32 %v2964_v4, %v1170_v10  ;;  %v1339_v12 = vpop.f32.mrf.mxu1 }
 0x1db   : > { %1693 = vst.msk [vmem:[%s2662_s17 + $0xdc] sm:$0xf] %vm1637_vm3, %v1628_v13  ;;  %v1340_v14 = vadd.f32 %v1339_v12, %v1171_v11 }
 0x1dc   : > { %v1508_v17 = vpop.f32.mrf.mxu2 }
 0x1dd   : > { %v1509_v19 = vadd.f32 %v1508_v17, %v1340_v14 }
 0x1de   : > { %v1553_v21 = vpop.f32.mrf.mxu3 }
 0x1df   : > { %v1611_v22 = vpack.c.bf16 %v1509_v19, %v1509_v19  ;;  %v1554_v7 = vadd.f32 %v1553_v21, %v2915_v52 }
 0x1e0   : > { %v1172_v23 = vpop.f32.mrf.mxu0 }
 0x1e1   : > { %1676 = vst.msk [vmem:[%s2662_s17 + $0x98] sm:$0xf] %vm1637_vm3, %v1611_v22  ;;  %v1629_v39 = vpack.c.bf16 %v1554_v7, %v1554_v7  ;;  %v1173_v24 = vadd.f32 %v2964_v4, %v1172_v23  ;;  %v1341_v25 = vpop.f32.mrf.mxu1 }
 0x1e3   : > { %1694 = vst.msk [vmem:[%s2662_s17 + $0xe0] sm:$0xf] %vm1637_vm3, %v1629_v39  ;;  %v1342_v58 = vadd.f32 %v1341_v25, %v1173_v24 }
 0x1e4   : > { %v1510_v38 = vpop.f32.mrf.mxu2 }
 0x1e5   : > { %v1511_v27 = vadd.f32 %v1510_v38, %v1342_v58 }
 0x1e6   : > { %v1555_v60 = vpop.f32.mrf.mxu3 }
 0x1e7   : > { %v1612_v29 = vpack.c.bf16 %v1511_v27, %v1511_v27  ;;  %v1556_v31 = vadd.f32 %v1555_v60, %v2930_v16 }
 0x1e8   : > { %v1175_v33 = vpop.f32.mrf.mxu0 }
 0x1e9   : > { %1677 = vst.msk [vmem:[%s2662_s17 + $0x9c] sm:$0xf] %vm1637_vm3, %v1612_v29  ;;  %v1630_v52 = vpack.c.bf16 %v1556_v31, %v1556_v31  ;;  %v1176_v34 = vadd.f32 %v2964_v4, %v1175_v33  ;;  %v1344_v36 = vpop.f32.mrf.mxu1 }
 0x1eb   : > { %1695 = vst.msk [vmem:[%s2662_s17 + $0xe4] sm:$0xf] %vm1637_vm3, %v1630_v52  ;;  %v1345_v28 = vadd.f32 %v1344_v36, %v1176_v34 }
 0x1ec   : > { %v1513_v20 = vpop.f32.mrf.mxu2 }
 0x1ed   : > { %v1514_v40 = vadd.f32 %v1513_v20, %v1345_v28 }
 0x1ee   : > { %v1558_v41 = vpop.f32.mrf.mxu3 }
 0x1ef   : > { %v1613_v45 = vpack.c.bf16 %v1514_v40, %v1514_v40  ;;  %v1559_v46 = vadd.f32 %v1558_v41, %v2939_v30 }
 0x1f0   : > { %v1177_v37 = vpop.f32.mrf.mxu0 }
 0x1f1   : > { %1678 = vst.msk [vmem:[%s2662_s17 + $0xa0] sm:$0xf] %vm1637_vm3, %v1613_v45  ;;  %v1631_v16 = vpack.c.bf16 %v1559_v46, %v1559_v46  ;;  %v1178_v47 = vadd.f32 %v2964_v4, %v1177_v37  ;;  %v1346_v48 = vpop.f32.mrf.mxu1 }
 0x1f3   : > { %1696 = vst.msk [vmem:[%s2662_s17 + $0xe8] sm:$0xf] %vm1637_vm3, %v1631_v16  ;;  %v1347_v8 = vadd.f32 %v1346_v48, %v1178_v47 }
 0x1f4   : > { %v1515_v49 = vpop.f32.mrf.mxu2 }
 0x1f5   : > { %v1516_v35 = vadd.f32 %v1515_v49, %v1347_v8 }
 0x1f6   : > { %v1560_v32 = vpop.f32.mrf.mxu3 }
 0x1f7   : > { %v1614_v50 = vpack.c.bf16 %v1516_v35, %v1516_v35  ;;  %v1561_v51 = vadd.f32 %v1560_v32, %v2954_v54 }
 0x1f8   : > { %v1180_v53 = vpop.f32.mrf.mxu0 }
 0x1f9   : > { %1679 = vst.msk [vmem:[%s2662_s17 + $0xa4] sm:$0xf] %vm1637_vm3, %v1614_v50  ;;  %v1632_v30 = vpack.c.bf16 %v1561_v51, %v1561_v51  ;;  %v1181_v55 = vadd.f32 %v2964_v4, %v1180_v53  ;;  %v1349_v42 = vpop.f32.mrf.mxu1 }
 0x1fb   : > { %1697 = vst.msk [vmem:[%s2662_s17 + $0xec] sm:$0xf] %vm1637_vm3, %v1632_v30  ;;  %v1350_v59 = vadd.f32 %v1349_v42, %v1181_v55 }
 0x1fc   : > { %v1518_v62 = vpop.f32.mrf.mxu2 }
 0x1fd   : > { %v1519_v0 = vadd.f32 %v1518_v62, %v1350_v59 }
 0x1fe   : > { %v1563_v61 = vpop.f32.mrf.mxu3 }
 0x1ff   : > { %v1615_v57 = vpack.c.bf16 %v1519_v0, %v1519_v0  ;;  %v1564_v2 = vadd.f32 %v1563_v61, %v2968_v9 }
 0x200   : > { %v1182_v5 = vpop.f32.mrf.mxu0 }
 0x201   : > { %1680 = vst.msk [vmem:[%s2662_s17 + $0xa8] sm:$0xf] %vm1637_vm3, %v1615_v57  ;;  %v1633_v54 = vpack.c.bf16 %v1564_v2, %v1564_v2  ;;  %v1183_v26 = vadd.f32 %v2964_v4, %v1182_v5  ;;  %v1351_v3 = vpop.f32.mrf.mxu1 }
 0x203   : > { %1698 = vst.msk [vmem:[%s2662_s17 + $0xf0] sm:$0xf] %vm1637_vm3, %v1633_v54  ;;  %v1352_v6 = vadd.f32 %v1351_v3, %v1183_v26 }
 0x204   : > { %v1520_v63 = vpop.f32.mrf.mxu2 }
 0x205   : > { %v1521_v43 = vadd.f32 %v1520_v63, %v1352_v6 }
 0x206   : > { %v1565_v10 = vpop.f32.mrf.mxu3 }
 0x207   : > { %v1616_v13 = vpack.c.bf16 %v1521_v43, %v1521_v43  ;;  %v1566_v11 = vadd.f32 %v1565_v10, %v2981_v15 }
 0x208   : > { %v1185_v12 = vpop.f32.mrf.mxu0 }
 0x209   : > { %1681 = vst.msk [vmem:[%s2662_s17 + $0xac] sm:$0xf] %vm1637_vm3, %v1616_v13  ;;  %v1634_v9 = vpack.c.bf16 %v1566_v11, %v1566_v11  ;;  %v1186_v14 = vadd.f32 %v2964_v4, %v1185_v12  ;;  %v1354_v17 = vpop.f32.mrf.mxu1 }
 0x20b   : > { %1699 = vst.msk [vmem:[%s2662_s17 + $0xf4] sm:$0xf] %vm1637_vm3, %v1634_v9  ;;  %v1355_v19 = vadd.f32 %v1354_v17, %v1186_v14 }
 0x20c   : > { %v1523_v21 = vpop.f32.mrf.mxu2 }
 0x20d   : > { %v1524_v22 = vadd.f32 %v1523_v21, %v1355_v19 }
 0x20e   : > { %v1568_v7 = vpop.f32.mrf.mxu3 }
 0x20f   : > { %v1617_v23 = vpack.c.bf16 %v1524_v22, %v1524_v22  ;;  %v1569_v39 = vadd.f32 %v1568_v7, %v2989_v56 }
 0x210   : > { %v1187_v24 = vpop.f32.mrf.mxu0 }
 0x211   : > { %1682 = vst.msk [vmem:[%s2662_s17 + $0xb0] sm:$0xf] %vm1637_vm3, %v1617_v23  ;;  %v1635_v15 = vpack.c.bf16 %v1569_v39, %v1569_v39  ;;  %v1188_v25 = vadd.f32 %v2964_v4, %v1187_v24  ;;  %v1356_v58 = vpop.f32.mrf.mxu1 }
 0x213   : > { %1700 = vst.msk [vmem:[%s2662_s17 + $0xf8] sm:$0xf] %vm1637_vm3, %v1635_v15  ;;  %v1357_v38 = vadd.f32 %v1356_v58, %v1188_v25 }
 0x214   : > { %v1525_v27 = vpop.f32.mrf.mxu2 }
 0x215   : > { %v1526_v60 = vadd.f32 %v1525_v27, %v1357_v38 }
 0x216   : > { %v1570_v29 = vpop.f32.mrf.mxu3 }
 0x217   : > { %v1618_v31 = vpack.c.bf16 %v1526_v60, %v1526_v60  ;;  %v1571_v33 = vadd.f32 %v1570_v29, %v2998_v1 }
 0x218   : > { %v1190_v52 = vpop.f32.mrf.mxu0 }
 0x219   : > { %1683 = vst.msk [vmem:[%s2662_s17 + $0xb4] sm:$0xf] %vm1637_vm3, %v1618_v31  ;;  %v1636_v56 = vpack.c.bf16 %v1571_v33, %v1571_v33  ;;  %v1191_v34 = vadd.f32 %v2964_v4, %v1190_v52  ;;  %v1359_v36 = vpop.f32.mrf.mxu1 }
 0x21b   : > { %1701 = vst.msk [vmem:[%s2662_s17 + $0xfc] sm:$0xf] %vm1637_vm3, %v1636_v56  ;;  %v1360_v28 = vadd.f32 %v1359_v36, %v1191_v34 }
 0x21c   : > { %v1528_v20 = vpop.f32.mrf.mxu2 }
 0x21d   : > { %v1529_v40 = vadd.f32 %v1528_v20, %v1360_v28 }
 0x21f   : > { %v1619_v41 = vpack.c.bf16 %v1529_v40, %v1529_v40 }
 0x220   : > { %v1192_v45 = vpop.f32.mrf.mxu0 }
 0x221   : > { %1684 = vst.msk [vmem:[%s2662_s17 + $0xb8] sm:$0xf] %vm1637_vm3, %v1619_v41  ;;  %v1193_v1 = vadd.f32 %v2964_v4, %v1192_v45  ;;  %v1361_v46 = vpop.f32.mrf.mxu1 }
 0x223   : > { %v1362_v37 = vadd.f32 %v1361_v46, %v1193_v1 }
 0x224   : > { %v1530_v16 = vpop.f32.mrf.mxu2 }
 0x225   : > { %v1531_v47 = vadd.f32 %v1530_v16, %v1362_v37 }
 0x227   : > { %v1620_v48 = vpack.c.bf16 %v1531_v47, %v1531_v47 }
 0x229   : > { %1685 = vst.msk [vmem:[%s2662_s17 + $0xbc] sm:$0xf] %vm1637_vm3, %v1620_v48 }
 0x22c   : > { %v1533_v8 = vpop.f32.mrf.mxu2 }
 0x22d   : > { %v1534_v49 = vadd.f32 %v1533_v8, %v2819_v18 }
 0x22f   : > { %v1621_v35 = vpack.c.bf16 %v1534_v49, %v1534_v49 }
 0x231   : > { %1686 = vst.msk [vmem:[%s2662_s17 + $0xc0] sm:$0xf] %vm1637_vm3, %v1621_v35 }
 0x234   : > { %v1535_v32 = vpop.f32.mrf.mxu2 }
 0x235   : > { %v1536_v50 = vadd.f32 %v1535_v32, %v2834_v44 }
 0x237   : > { %v1622_v51 = vpack.c.bf16 %v1536_v50, %v1536_v50 }
 0x239   : > { %1687 = vst.msk [vmem:[%s2662_s17 + $0xc4] sm:$0xf] %vm1637_vm3, %v1622_v51 }
 0x23a PF: > { %s13_s12 = sadd.s32 1, %s2426_s12  }
 0x23b   : > { %p10_p4 = scmp.ge.s32.totalorder %s13_s12, 10  }
 0x23d   :  { %12 = sbr.rel (!%p10_p4) target bundleno = 1 (0x1), region = 62 }

</bundles_post_ra>
